<compile_context>
chip_gen: v5e
topology: v5e:2x2
jax: 0.10.0
libtpu: 0.0.40
codegen_flags: <defaults>
</compile_context>

<pallas_src>
import functools

import numpy as np

import jax
import jax.numpy as jnp
from jax.experimental import pallas as pl
from jax.experimental.pallas import tpu as pltpu

EPS = 1e-5  # torch.nn.LayerNorm default eps


def _layernorm(x, gamma, beta):
    mean = jnp.mean(x, axis=-1, keepdims=True)
    var = jnp.mean((x - mean) ** 2, axis=-1, keepdims=True)
    return (x - mean) * jax.lax.rsqrt(var + EPS) * gamma + beta


def _vmem_limit_bytes():
    """Per-generation scoped-VMEM limit (conservative on v7x, generous on v5e/v6e)."""
    try:
        kind = jax.devices()[0].device_kind.lower()
    except Exception:  # pragma: no cover
        kind = ""
    if "v7" in kind:
        return 48 * 1024 * 1024       # 64 MiB physical VMEM: leave headroom
    if "v5" in kind or "v6" in kind:
        return 100 * 1024 * 1024      # 128 MiB physical VMEM
    return 64 * 1024 * 1024


# --------------------------------------------------------------------------
# pathway embedding, gridded over pathways p:
#   masked-LN(W_p) -> Linear(W_p, D) [bf16 weights] -> LN(D)
# blocks: x (1, B, Wmax), mask (1, 1, Wmax), invc (1, 1, 1), w (1, Wmax, D)
# --------------------------------------------------------------------------
def embed_kernel(x_ref, mask_ref, invc_ref, g1_ref, b1_ref, w_ref, b_ref,
                 g2_ref, b2_ref, o_ref):
    x = x_ref[0]                                      # (B, Wmax), zero padded
    mask = mask_ref[0]                                # (1, Wmax)
    invc = invc_ref[0]                                # (1, 1) = 1/(p_i + 1)

    # masked LayerNorm over the real (unpadded) width
    mean = jnp.sum(x * mask, axis=-1, keepdims=True) * invc
    diff = (x - mean) * mask
    var = jnp.sum(diff * diff, axis=-1, keepdims=True) * invc
    xn = diff * jax.lax.rsqrt(var + EPS) * g1_ref[0] + b1_ref[0]     # pads -> 0

    # Linear(W_p, D); padded weight rows are zero
    y = jnp.dot(xn.astype(jnp.bfloat16), w_ref[0],
                preferred_element_type=jnp.float32) + b_ref[0]       # (B, D)

    # LayerNorm over D
    m2 = jnp.mean(y, axis=-1, keepdims=True)
    v2 = jnp.mean((y - m2) ** 2, axis=-1, keepdims=True)
    o_ref[0] = (y - m2) * jax.lax.rsqrt(v2 + EPS) * g2_ref[0] + b2_ref[0]


# --------------------------------------------------------------------------
# fused transformer: grid = (batch_tiles, depth); activations (rows, D) stay
# resident in o_ref across the depth axis.
#   x = x + Attn(LN(x)); x = x + FF(LN(x))
# --------------------------------------------------------------------------
def tx_kernel(x_ref, ln1_g, ln1_b, wqkv_ref, wproj_ref, bproj_ref,
              ln2_g, ln2_b, w1_ref, b1_ref, w2_ref, b2_ref, o_ref,
              *, heads, dim_head, seq_len, valid_len):
    # layer 0: bring the input activations into the resident output block
    @pl.when(pl.program_id(1) == 0)
    def _():
        o_ref[...] = x_ref[...]

    M, D = o_ref.shape                               # M = B_tile * seq_len
    B = M // seq_len
    N = seq_len
    inner = heads * dim_head
    scale = dim_head ** -0.5

    x = o_ref[...]                                   # (M, D), f32

    # additive key mask for the zero-padded sequence tail (static shapes)
    if valid_len < seq_len:
        kidx = jax.lax.broadcasted_iota(jnp.int32, (1, seq_len), 1)
        kmask = jnp.where(kidx < valid_len, 0.0, -1e30).astype(jnp.float32)
    else:
        kmask = None

    # ---- PreNorm multi-head attention ----
    xn = _layernorm(x, ln1_g[0], ln1_b[0])           # (M, D)
    qkv = jnp.dot(xn.astype(jnp.bfloat16), wqkv_ref[0],
                  preferred_element_type=jnp.float32)      # (M, 3*inner) fused
    q = qkv[:, :inner]
    k = qkv[:, inner:2 * inner]
    v = qkv[:, 2 * inner:]

    head_outs = []
    for h in range(heads):                           # tiny score/value einsums
        sl = slice(h * dim_head, (h + 1) * dim_head)
        qh = q[:, sl].reshape(B, N, dim_head)
        kh = k[:, sl].reshape(B, N, dim_head)
        vh = v[:, sl].reshape(B, N, dim_head)
        dots = jnp.einsum("bnd,bmd->bnm", qh.astype(jnp.bfloat16),
                          kh.astype(jnp.bfloat16),
                          preferred_element_type=jnp.float32) * scale
        if kmask is not None:
            dots = dots + kmask                      # mask padded keys
        dots = dots - jnp.max(dots, axis=-1, keepdims=True)
        e = jnp.exp(dots)
        attn = e / jnp.sum(e, axis=-1, keepdims=True)
        oh = jnp.einsum("bnm,bmd->bnd", attn.astype(jnp.bfloat16),
                        vh.astype(jnp.bfloat16),
                        preferred_element_type=jnp.float32)
        head_outs.append(oh.reshape(M, dim_head))

    out_re = jnp.concatenate(head_outs, axis=-1)     # (M, inner) == concat heads
    attn_out = jnp.dot(out_re.astype(jnp.bfloat16), wproj_ref[0],
                       preferred_element_type=jnp.float32) + bproj_ref[0]
    x = x + attn_out                                 # residual

    # ---- PreNorm feed-forward ----
    xn2 = _layernorm(x, ln2_g[0], ln2_b[0])
    h1 = jnp.dot(xn2.astype(jnp.bfloat16), w1_ref[0],
                 preferred_element_type=jnp.float32) + b1_ref[0]
    # TODO(synk): exact erf GELU (nn.GELU default) replaced by tanh approximation.
    h1 = jax.nn.gelu(h1, approximate=True)
    y = jnp.dot(h1.astype(jnp.bfloat16), w2_ref[0],
                preferred_element_type=jnp.float32) + b2_ref[0]

    o_ref[...] = x + y                               # residual; stays in VMEM


# --------------------------------------------------------------------------
# classification head: LN(D) -> Linear(D, num_classes), lane-padded output
# --------------------------------------------------------------------------
def head_kernel(x_ref, g_ref, b_ref, w_ref, bias_ref, o_ref):
    xn = _layernorm(x_ref[...], g_ref[...], b_ref[...])
    o_ref[...] = jnp.dot(xn.astype(jnp.bfloat16), w_ref[...],
                         preferred_element_type=jnp.float32) + bias_ref[...]


# --------------------------------------------------------------------------
# one-time parameter preparation (stacking / padding / bf16 cast), hoisted
# out of the forward pass.
# --------------------------------------------------------------------------
def prepare_params(params, *, pathway_number, heads, dim_head):
    widths = [p + 1 for p in pathway_number]
    Wmax = max(widths)
    dim = params["cls_token"].shape[0]

    g1_l, b1_l, w_l, b_l, g2_l, b2_l = [], [], [], [], [], []
    for i, w in enumerate(widths):
        e = params["embed"][i]
        g1_l.append(jnp.pad(e["g1"], (0, Wmax - w)))
        b1_l.append(jnp.pad(e["b1"], (0, Wmax - w)))
        w_l.append(jnp.pad(e["w"], ((0, Wmax - w), (0, 0))))   # pad rows with 0
        b_l.append(e["b"]); g2_l.append(e["g2"]); b2_l.append(e["b2"])

    emb = dict(
        mask=jnp.asarray(np.array([[1.0] * w + [0.0] * (Wmax - w) for w in widths],
                                  np.float32))[:, None, :],        # (P, 1, Wmax)
        invc=jnp.asarray(np.array([1.0 / w for w in widths],
                                  np.float32))[:, None, None],     # (P, 1, 1)
        g1=jnp.stack(g1_l, 0)[:, None, :], b1=jnp.stack(b1_l, 0)[:, None, :],
        w=jnp.stack(w_l, 0).astype(jnp.bfloat16),                  # (P, Wmax, D)
        b=jnp.stack(b_l, 0)[:, None, :],
        g2=jnp.stack(g2_l, 0)[:, None, :], b2=jnp.stack(b2_l, 0)[:, None, :])

    L = params["layers"]
    depth = len(L)
    inner = heads * dim_head

    def stack(name):
        return jnp.stack([layer[name] for layer in L], 0)

    project_out = not (heads == 1 and dim_head == dim)
    if project_out:
        wproj = stack("wproj").astype(jnp.bfloat16)                # (depth, inner, D)
        bproj = stack("bproj")[:, None, :]
    else:  # Attention.project == nn.Identity()
        wproj = jnp.broadcast_to(jnp.eye(dim, dtype=jnp.bfloat16), (depth, dim, dim))
        bproj = jnp.zeros((depth, 1, dim), jnp.float32)

    tx = dict(
        ln1_g=stack("ln1_g")[:, None, :], ln1_b=stack("ln1_b")[:, None, :],
        wqkv=stack("wqkv").astype(jnp.bfloat16),                   # (depth, D, 3*inner)
        wproj=wproj, bproj=bproj,
        ln2_g=stack("ln2_g")[:, None, :], ln2_b=stack("ln2_b")[:, None, :],
        w1=stack("w1").astype(jnp.bfloat16), b1=stack("b1")[:, None, :],
        w2=stack("w2").astype(jnp.bfloat16), b2=stack("b2")[:, None, :])

    hp = params["head"]
    C = hp["w"].shape[1]
    Cp = ((C + 127) // 128) * 128                                  # lane-dense classes
    head = dict(g=hp["g"][None, :], b=hp["b"][None, :],
                w=jnp.pad(hp["w"], ((0, 0), (0, Cp - C))).astype(jnp.bfloat16),
                bias=jnp.pad(hp["bias"], (0, Cp - C))[None, :])

    return dict(emb=emb, tx=tx, head=head, cls_token=params["cls_token"])


# --------------------------------------------------------------------------
# full forward pass (jit-able; all static config via kwargs)
# --------------------------------------------------------------------------
def vit_forward(genes, prep, *, categories, pathway_number, heads, dim_head,
                num_classes):
    B = genes.shape[0]
    dim = prep["cls_token"].shape[0]
    P = len(pathway_number)
    widths = [p + 1 for p in pathway_number]
    Wmax = prep["emb"]["mask"].shape[-1]

    # ---------------- pathway inputs: split, append category, pad ----------
    offs = np.concatenate([[0], np.cumsum(pathway_number)])
    seg_l = []
    for i, w in enumerate(widths):
        seg = genes[:, int(offs[i]):int(offs[i + 1])]                 # (B, p_i)
        cat = jnp.full((B, 1), categories[i], dtype=genes.dtype)      # append_category
        seg = jnp.concatenate([seg, cat], axis=-1)                    # (B, p_i + 1)
        seg_l.append(jnp.pad(seg, ((0, 0), (0, Wmax - w))))
    x_stack = jnp.stack(seg_l, 0).astype(jnp.float32)                 # (P, B, Wmax)

    e = prep["emb"]
    emb = pl.pallas_call(
        embed_kernel,
        out_shape=jax.ShapeDtypeStruct((P, B, dim), jnp.float32),
        grid=(P,),
        in_specs=[
            pl.BlockSpec((1, B, Wmax), lambda p: (p, 0, 0)),          # genes+cat
            pl.BlockSpec((1, 1, Wmax), lambda p: (p, 0, 0)),          # mask
            pl.BlockSpec((1, 1, 1), lambda p: (p, 0, 0)),             # 1/width
            pl.BlockSpec((1, 1, Wmax), lambda p: (p, 0, 0)),          # LN1 gamma
            pl.BlockSpec((1, 1, Wmax), lambda p: (p, 0, 0)),          # LN1 beta
            pl.BlockSpec((1, Wmax, dim), lambda p: (p, 0, 0)),        # W (bf16)
            pl.BlockSpec((1, 1, dim), lambda p: (p, 0, 0)),           # bias
            pl.BlockSpec((1, 1, dim), lambda p: (p, 0, 0)),           # LN2 gamma
            pl.BlockSpec((1, 1, dim), lambda p: (p, 0, 0)),           # LN2 beta
        ],
        out_specs=pl.BlockSpec((1, B, dim), lambda p: (p, 0, 0)),
        compiler_params=pltpu.CompilerParams(dimension_semantics=("parallel",)),
    )(x_stack, e["mask"], e["invc"], e["g1"], e["b1"], e["w"], e["b"],
      e["g2"], e["b2"])                                               # (P, B, D)

    tokens = jnp.transpose(emb, (1, 0, 2))                            # (B, P, D)
    cls = jnp.broadcast_to(prep["cls_token"][None, None, :], (B, 1, dim))
    x = jnp.concatenate([cls, tokens], axis=1)                        # (B, N, D)
    N = x.shape[1]
    # TODO(synk): emb_dropout / attention dropout / FF dropout are identity (eval).

    # sublane-align the sequence and flatten to lane-dense 2-D activations
    Np = ((N + 7) // 8) * 8
    x = jnp.pad(x, ((0, 0), (0, Np - N), (0, 0)))
    x2 = x.reshape(B * Np, dim)                                       # (M, D)

    t = prep["tx"]
    depth = t["wqkv"].shape[0]
    inner = heads * dim_head
    mlp = t["w1"].shape[-1]

    # parallel batch-tile axis (2 tiles when sublane-aligned -> feeds v7x's 2 TCs)
    bt = 2 if (B % 2 == 0 and ((B // 2) * Np) % 8 == 0) else 1
    rows = (B // bt) * Np

    kernel = functools.partial(tx_kernel, heads=heads, dim_head=dim_head,
                               seq_len=Np, valid_len=N)
    x2 = pl.pallas_call(
        kernel,
        out_shape=jax.ShapeDtypeStruct((B * Np, dim), jnp.float32),
        grid=(bt, depth),
        in_specs=[
            pl.BlockSpec((rows, dim), lambda i, l: (i, 0)),           # x (layer-0 init)
            pl.BlockSpec((1, 1, dim), lambda i, l: (l, 0, 0)),        # ln1 gamma
            pl.BlockSpec((1, 1, dim), lambda i, l: (l, 0, 0)),        # ln1 beta
            pl.BlockSpec((1, dim, 3 * inner), lambda i, l: (l, 0, 0)),  # Wqkv (bf16)
            pl.BlockSpec((1, inner, dim), lambda i, l: (l, 0, 0)),    # Wproj (bf16)
            pl.BlockSpec((1, 1, dim), lambda i, l: (l, 0, 0)),        # bproj
            pl.BlockSpec((1, 1, dim), lambda i, l: (l, 0, 0)),        # ln2 gamma
            pl.BlockSpec((1, 1, dim), lambda i, l: (l, 0, 0)),        # ln2 beta
            pl.BlockSpec((1, dim, mlp), lambda i, l: (l, 0, 0)),      # W1 (bf16)
            pl.BlockSpec((1, 1, mlp), lambda i, l: (l, 0, 0)),        # b1
            pl.BlockSpec((1, mlp, dim), lambda i, l: (l, 0, 0)),      # W2 (bf16)
            pl.BlockSpec((1, 1, dim), lambda i, l: (l, 0, 0)),        # b2
        ],
        out_specs=pl.BlockSpec((rows, dim), lambda i, l: (i, 0)),     # resident acts
        compiler_params=pltpu.CompilerParams(
            dimension_semantics=("parallel", "arbitrary"),
            vmem_limit_bytes=_vmem_limit_bytes()),
    )(x2, t["ln1_g"], t["ln1_b"], t["wqkv"], t["wproj"], t["bproj"],
      t["ln2_g"], t["ln2_b"], t["w1"], t["b1"], t["w2"], t["b2"])

    # ---------------- classification head (lane-padded output) -------------
    cls_out = x2.reshape(B, Np, dim)[:, 0, :]                         # (B, D) cls token
    h = prep["head"]
    Cp = h["w"].shape[1]
    out = pl.pallas_call(
        head_kernel,
        out_shape=jax.ShapeDtypeStruct((B, Cp), jnp.float32),
    )(cls_out, h["g"], h["b"], h["w"], h["bias"])
    return out[:, :num_classes]


# --------------------------------------------------------------------------
# deterministic parameter init (natural PyTorch-like shapes)
# --------------------------------------------------------------------------
def init_params(key, *, pathway_number, dim, depth, heads, dim_head, mlp_dim,
                num_classes):
    inner = heads * dim_head
    n_keys = len(pathway_number) + 4 * depth + 2
    keys = iter(jax.random.split(key, n_keys))

    def nrm(shape, scale=0.02):
        return (scale * jax.random.normal(next(keys), shape)).astype(jnp.float32)

    embed = []
    for p in pathway_number:
        embed.append(dict(
            g1=jnp.ones((p + 1,), jnp.float32), b1=jnp.zeros((p + 1,), jnp.float32),
            w=nrm((p + 1, dim)), b=jnp.zeros((dim,), jnp.float32),
            g2=jnp.ones((dim,), jnp.float32), b2=jnp.zeros((dim,), jnp.float32)))

    layers = []
    for _ in range(depth):
        layers.append(dict(
            ln1_g=jnp.ones((dim,), jnp.float32), ln1_b=jnp.zeros((dim,), jnp.float32),
            wqkv=nrm((dim, 3 * inner)),
            wproj=nrm((inner, dim)), bproj=jnp.zeros((dim,), jnp.float32),
            ln2_g=jnp.ones((dim,), jnp.float32), ln2_b=jnp.zeros((dim,), jnp.float32),
            w1=nrm((dim, mlp_dim)), b1=jnp.zeros((mlp_dim,), jnp.float32),
            w2=nrm((mlp_dim, dim)), b2=jnp.zeros((dim,), jnp.float32)))

    head = dict(g=jnp.ones((dim,), jnp.float32), b=jnp.zeros((dim,), jnp.float32),
                w=nrm((dim, num_classes)), bias=jnp.zeros((num_classes,), jnp.float32))

    cls_token = nrm((dim,), scale=1.0)
    return dict(embed=embed, layers=layers, head=head, cls_token=cls_token)


if __name__ == "__main__":
    # small, forward-consistent shapes
    pathway_number = [5, 7, 3]            # gene counts per pathway
    categories = [0.0, 1.0, 2.0]          # one category scalar per pathway
    dim, depth, heads, dim_head = 32, 2, 4, 8
    mlp_dim, num_classes = 64, 3
    B = 2

    key = jax.random.PRNGKey(0)
    k_x, k_p = jax.random.split(key)
    genes = jax.random.normal(k_x, (B, sum(pathway_number)), dtype=jnp.float32)

    params = init_params(
        k_p, pathway_number=pathway_number, dim=dim, depth=depth, heads=heads,
        dim_head=dim_head, mlp_dim=mlp_dim, num_classes=num_classes)

    # one-time weight stacking / padding / bf16 cast (hoisted out of forward)
    prep = prepare_params(params, pathway_number=pathway_number, heads=heads,
                          dim_head=dim_head)

    fwd = jax.jit(functools.partial(
        vit_forward, categories=categories, pathway_number=pathway_number,
        heads=heads, dim_head=dim_head, num_classes=num_classes))

    out = fwd(genes, prep)
    out = jax.block_until_ready(out)
    assert out.shape == (B, num_classes) and out.dtype == jnp.float32
    assert bool(jnp.all(jnp.isfinite(out)))
    print("KERNEL_OK")
</pallas_src>

<mosaic_0001>
module attributes {stable_mosaic.version = 11 : i64} {
  func.func @head_kernel(%arg0: memref<2x32xf32, #tpu.memory_space<vmem>>, %arg1: memref<1x32xf32, #tpu.memory_space<vmem>>, %arg2: memref<1x32xf32, #tpu.memory_space<vmem>>, %arg3: memref<32x128xbf16, #tpu.memory_space<vmem>>, %arg4: memref<1x128xf32, #tpu.memory_space<vmem>>, %arg5: memref<2x128xf32, #tpu.memory_space<vmem>>) attributes {dimension_semantics = [], scalar_prefetch = 0 : i64, scratch_operands = 0 : i64, tpu.core_type = #tpu.core_type<tc>} {
    %c0 = arith.constant 0 : index
    %c0_0 = arith.constant 0 : index
    %0 = vector.load %arg0[%c0, %c0_0] : memref<2x32xf32, #tpu.memory_space<vmem>>, vector<2x32xf32>
    %c0_1 = arith.constant 0 : index
    %c0_2 = arith.constant 0 : index
    %1 = vector.load %arg1[%c0_1, %c0_2] : memref<1x32xf32, #tpu.memory_space<vmem>>, vector<1x32xf32>
    %c0_3 = arith.constant 0 : index
    %c0_4 = arith.constant 0 : index
    %2 = vector.load %arg2[%c0_3, %c0_4] : memref<1x32xf32, #tpu.memory_space<vmem>>, vector<1x32xf32>
    %cst = arith.constant dense<0.000000e+00> : vector<2xf32>
    %3 = vector.multi_reduction <add>, %0, %cst [1] : vector<2x32xf32> to vector<2xf32>
    %4 = vector.shape_cast %3 : vector<2xf32> to vector<2x1xf32>
    %cst_5 = arith.constant 3.200000e+01 : f32
    %5 = vector.broadcast %cst_5 : f32 to vector<2x1xf32>
    %6 = arith.divf %4, %5 : vector<2x1xf32>
    %7 = vector.broadcast %6 : vector<2x1xf32> to vector<2x32xf32>
    %8 = arith.subf %0, %7 : vector<2x32xf32>
    %9 = arith.mulf %8, %8 : vector<2x32xf32>
    %cst_6 = arith.constant dense<0.000000e+00> : vector<2xf32>
    %10 = vector.multi_reduction <add>, %9, %cst_6 [1] : vector<2x32xf32> to vector<2xf32>
    %11 = vector.shape_cast %10 : vector<2xf32> to vector<2x1xf32>
    %cst_7 = arith.constant 3.200000e+01 : f32
    %12 = vector.broadcast %cst_7 : f32 to vector<2x1xf32>
    %13 = arith.divf %11, %12 : vector<2x1xf32>
    %14 = vector.broadcast %6 : vector<2x1xf32> to vector<2x32xf32>
    %15 = arith.subf %0, %14 : vector<2x32xf32>
    %cst_8 = arith.constant 9.99999974E-6 : f32
    %16 = vector.broadcast %cst_8 : f32 to vector<2x1xf32>
    %17 = arith.addf %13, %16 : vector<2x1xf32>
    %18 = math.rsqrt %17 : vector<2x1xf32>
    %19 = vector.broadcast %18 : vector<2x1xf32> to vector<2x32xf32>
    %20 = arith.mulf %15, %19 : vector<2x32xf32>
    %21 = vector.broadcast %1 : vector<1x32xf32> to vector<2x32xf32>
    %22 = arith.mulf %20, %21 : vector<2x32xf32>
    %23 = vector.broadcast %2 : vector<1x32xf32> to vector<2x32xf32>
    %24 = arith.addf %22, %23 : vector<2x32xf32>
    %25 = arith.truncf %24 : vector<2x32xf32> to vector<2x32xbf16>
    %c0_9 = arith.constant 0 : index
    %c0_10 = arith.constant 0 : index
    %26 = vector.load %arg3[%c0_9, %c0_10] : memref<32x128xbf16, #tpu.memory_space<vmem>>, vector<32x128xbf16>
    %cst_11 = arith.constant dense<0.000000e+00> : vector<2x128xf32>
    %27 = tpu.matmul %25, %26, %cst_11 {dimension_numbers = #tpu.dot_dimension_numbers<[1], [0], [0], [1], [0, 0, 1, 1], [], []>} : vector<2x32xbf16>, vector<32x128xbf16>, vector<2x128xf32> -> vector<2x128xf32>
    %c0_12 = arith.constant 0 : index
    %c0_13 = arith.constant 0 : index
    %28 = vector.load %arg4[%c0_12, %c0_13] : memref<1x128xf32, #tpu.memory_space<vmem>>, vector<1x128xf32>
    %29 = vector.broadcast %28 : vector<1x128xf32> to vector<2x128xf32>
    %30 = arith.addf %27, %29 : vector<2x128xf32>
    %c0_14 = arith.constant 0 : index
    %c0_15 = arith.constant 0 : index
    %31 = vector.load %arg5[%c0_14, %c0_15] : memref<2x128xf32, #tpu.memory_space<vmem>>, vector<2x128xf32>
    tpu.vector_store %arg5[%c0_14, %c0_15], %30 {strides = array<i32>} : memref<2x128xf32, #tpu.memory_space<vmem>>, vector<2x128xf32>,
    return
  }
}

module attributes {stable_mosaic.version = 11 : i64} {
  func.func @embed_kernel(%arg0: i32, %arg1: memref<1x2x8xf32, #tpu.memory_space<vmem>>, %arg2: memref<1x1x8xf32, #tpu.memory_space<vmem>>, %arg3: memref<1x1x1xf32, #tpu.memory_space<vmem>>, %arg4: memref<1x1x8xf32, #tpu.memory_space<vmem>>, %arg5: memref<1x1x8xf32, #tpu.memory_space<vmem>>, %arg6: memref<1x8x32xbf16, #tpu.memory_space<vmem>>, %arg7: memref<1x1x32xf32, #tpu.memory_space<vmem>>, %arg8: memref<1x1x32xf32, #tpu.memory_space<vmem>>, %arg9: memref<1x1x32xf32, #tpu.memory_space<vmem>>, %arg10: memref<1x2x32xf32, #tpu.memory_space<vmem>>) attributes {dimension_semantics = [#tpu.dimension_semantics<parallel>], iteration_bounds = array<i64: 3>, scalar_prefetch = 0 : i64, scratch_operands = 0 : i64, tpu.core_type = #tpu.core_type<tc>, window_params = [{transform_indices = @transform_0, window_bounds = array<i64: 1, 2, 8>}, {transform_indices = @transform_1, window_bounds = array<i64: 1, 1, 8>}, {transform_indices = @transform_2, window_bounds = array<i64: 1, 1, 1>}, {transform_indices = @transform_3, window_bounds = array<i64: 1, 1, 8>}, {transform_indices = @transform_4, window_bounds = array<i64: 1, 1, 8>}, {transform_indices = @transform_5, window_bounds = array<i64: 1, 8, 32>}, {transform_indices = @transform_6, window_bounds = array<i64: 1, 1, 32>}, {transform_indices = @transform_7, window_bounds = array<i64: 1, 1, 32>}, {transform_indices = @transform_8, window_bounds = array<i64: 1, 1, 32>}, {transform_indices = @transform_9, window_bounds = array<i64: 1, 2, 32>}]} {
    %c0 = arith.constant 0 : index
    %c0_0 = arith.constant 0 : index
    %c0_1 = arith.constant 0 : index
    %0 = vector.load %arg1[%c0, %c0_0, %c0_1] : memref<1x2x8xf32, #tpu.memory_space<vmem>>, vector<1x2x8xf32>
    %1 = vector.shape_cast %0 : vector<1x2x8xf32> to vector<2x8xf32>
    %c0_2 = arith.constant 0 : index
    %c0_3 = arith.constant 0 : index
    %c0_4 = arith.constant 0 : index
    %2 = vector.load %arg2[%c0_2, %c0_3, %c0_4] : memref<1x1x8xf32, #tpu.memory_space<vmem>>, vector<1x1x8xf32>
    %3 = vector.shape_cast %2 : vector<1x1x8xf32> to vector<1x8xf32>
    %c0_5 = arith.constant 0 : index
    %c0_6 = arith.constant 0 : index
    %c0_7 = arith.constant 0 : index
    %4 = vector.load %arg3[%c0_5, %c0_6, %c0_7] : memref<1x1x1xf32, #tpu.memory_space<vmem>>, vector<1x1x1xf32>
    %5 = vector.shape_cast %4 : vector<1x1x1xf32> to vector<1x1xf32>
    %6 = vector.broadcast %3 : vector<1x8xf32> to vector<2x8xf32>
    %7 = arith.mulf %1, %6 : vector<2x8xf32>
    %cst = arith.constant dense<0.000000e+00> : vector<2xf32>
    %8 = vector.multi_reduction <add>, %7, %cst [1] : vector<2x8xf32> to vector<2xf32>
    %9 = vector.shape_cast %8 : vector<2xf32> to vector<2x1xf32>
    %10 = vector.broadcast %5 : vector<1x1xf32> to vector<2x1xf32>
    %11 = arith.mulf %9, %10 : vector<2x1xf32>
    %12 = vector.broadcast %11 : vector<2x1xf32> to vector<2x8xf32>
    %13 = arith.subf %1, %12 : vector<2x8xf32>
    %14 = vector.broadcast %3 : vector<1x8xf32> to vector<2x8xf32>
    %15 = arith.mulf %13, %14 : vector<2x8xf32>
    %16 = arith.mulf %15, %15 : vector<2x8xf32>
    %cst_8 = arith.constant dense<0.000000e+00> : vector<2xf32>
    %17 = vector.multi_reduction <add>, %16, %cst_8 [1] : vector<2x8xf32> to vector<2xf32>
    %18 = vector.shape_cast %17 : vector<2xf32> to vector<2x1xf32>
    %19 = vector.broadcast %5 : vector<1x1xf32> to vector<2x1xf32>
    %20 = arith.mulf %18, %19 : vector<2x1xf32>
    %cst_9 = arith.constant 9.99999974E-6 : f32
    %21 = vector.broadcast %cst_9 : f32 to vector<2x1xf32>
    %22 = arith.addf %20, %21 : vector<2x1xf32>
    %23 = math.rsqrt %22 : vector<2x1xf32>
    %24 = vector.broadcast %23 : vector<2x1xf32> to vector<2x8xf32>
    %25 = arith.mulf %15, %24 : vector<2x8xf32>
    %c0_10 = arith.constant 0 : index
    %c0_11 = arith.constant 0 : index
    %c0_12 = arith.constant 0 : index
    %26 = vector.load %arg4[%c0_10, %c0_11, %c0_12] : memref<1x1x8xf32, #tpu.memory_space<vmem>>, vector<1x1x8xf32>
    %27 = vector.shape_cast %26 : vector<1x1x8xf32> to vector<1x8xf32>
    %28 = vector.broadcast %27 : vector<1x8xf32> to vector<2x8xf32>
    %29 = arith.mulf %25, %28 : vector<2x8xf32>
    %c0_13 = arith.constant 0 : index
    %c0_14 = arith.constant 0 : index
    %c0_15 = arith.constant 0 : index
    %30 = vector.load %arg5[%c0_13, %c0_14, %c0_15] : memref<1x1x8xf32, #tpu.memory_space<vmem>>, vector<1x1x8xf32>
    %31 = vector.shape_cast %30 : vector<1x1x8xf32> to vector<1x8xf32>
    %32 = vector.broadcast %31 : vector<1x8xf32> to vector<2x8xf32>
    %33 = arith.addf %29, %32 : vector<2x8xf32>
    %34 = arith.truncf %33 : vector<2x8xf32> to vector<2x8xbf16>
    %c0_16 = arith.constant 0 : index
    %c0_17 = arith.constant 0 : index
    %c0_18 = arith.constant 0 : index
    %35 = vector.load %arg6[%c0_16, %c0_17, %c0_18] : memref<1x8x32xbf16, #tpu.memory_space<vmem>>, vector<1x8x32xbf16>
    %36 = vector.shape_cast %35 : vector<1x8x32xbf16> to vector<8x32xbf16>
    %cst_19 = arith.constant dense<0.000000e+00> : vector<2x32xf32>
    %37 = tpu.matmul %34, %36, %cst_19 {dimension_numbers = #tpu.dot_dimension_numbers<[1], [0], [0], [1], [0, 0, 1, 1], [], []>} : vector<2x8xbf16>, vector<8x32xbf16>, vector<2x32xf32> -> vector<2x32xf32>
    %c0_20 = arith.constant 0 : index
    %c0_21 = arith.constant 0 : index
    %c0_22 = arith.constant 0 : index
    %38 = vector.load %arg7[%c0_20, %c0_21, %c0_22] : memref<1x1x32xf32, #tpu.memory_space<vmem>>, vector<1x1x32xf32>
    %39 = vector.shape_cast %38 : vector<1x1x32xf32> to vector<1x32xf32>
    %40 = vector.broadcast %39 : vector<1x32xf32> to vector<2x32xf32>
    %41 = arith.addf %37, %40 : vector<2x32xf32>
    %cst_23 = arith.constant dense<0.000000e+00> : vector<2xf32>
    %42 = vector.multi_reduction <add>, %41, %cst_23 [1] : vector<2x32xf32> to vector<2xf32>
    %43 = vector.shape_cast %42 : vector<2xf32> to vector<2x1xf32>
    %cst_24 = arith.constant 3.200000e+01 : f32
    %44 = vector.broadcast %cst_24 : f32 to vector<2x1xf32>
    %45 = arith.divf %43, %44 : vector<2x1xf32>
    %46 = vector.broadcast %45 : vector<2x1xf32> to vector<2x32xf32>
    %47 = arith.subf %41, %46 : vector<2x32xf32>
    %48 = arith.mulf %47, %47 : vector<2x32xf32>
    %cst_25 = arith.constant dense<0.000000e+00> : vector<2xf32>
    %49 = vector.multi_reduction <add>, %48, %cst_25 [1] : vector<2x32xf32> to vector<2xf32>
    %50 = vector.shape_cast %49 : vector<2xf32> to vector<2x1xf32>
    %cst_26 = arith.constant 3.200000e+01 : f32
    %51 = vector.broadcast %cst_26 : f32 to vector<2x1xf32>
    %52 = arith.divf %50, %51 : vector<2x1xf32>
    %53 = vector.broadcast %45 : vector<2x1xf32> to vector<2x32xf32>
    %54 = arith.subf %41, %53 : vector<2x32xf32>
    %cst_27 = arith.constant 9.99999974E-6 : f32
    %55 = vector.broadcast %cst_27 : f32 to vector<2x1xf32>
    %56 = arith.addf %52, %55 : vector<2x1xf32>
    %57 = math.rsqrt %56 : vector<2x1xf32>
    %58 = vector.broadcast %57 : vector<2x1xf32> to vector<2x32xf32>
    %59 = arith.mulf %54, %58 : vector<2x32xf32>
    %c0_28 = arith.constant 0 : index
    %c0_29 = arith.constant 0 : index
    %c0_30 = arith.constant 0 : index
    %60 = vector.load %arg8[%c0_28, %c0_29, %c0_30] : memref<1x1x32xf32, #tpu.memory_space<vmem>>, vector<1x1x32xf32>
    %61 = vector.shape_cast %60 : vector<1x1x32xf32> to vector<1x32xf32>
    %62 = vector.broadcast %61 : vector<1x32xf32> to vector<2x32xf32>
    %63 = arith.mulf %59, %62 : vector<2x32xf32>
    %c0_31 = arith.constant 0 : index
    %c0_32 = arith.constant 0 : index
    %c0_33 = arith.constant 0 : index
    %64 = vector.load %arg9[%c0_31, %c0_32, %c0_33] : memref<1x1x32xf32, #tpu.memory_space<vmem>>, vector<1x1x32xf32>
    %65 = vector.shape_cast %64 : vector<1x1x32xf32> to vector<1x32xf32>
    %66 = vector.broadcast %65 : vector<1x32xf32> to vector<2x32xf32>
    %67 = arith.addf %63, %66 : vector<2x32xf32>
    %c0_34 = arith.constant 0 : index
    %c0_35 = arith.constant 0 : index
    %c0_36 = arith.constant 0 : index
    %68 = vector.load %arg10[%c0_34, %c0_35, %c0_36] : memref<1x2x32xf32, #tpu.memory_space<vmem>>, vector<1x2x32xf32>
    %69 = vector.shape_cast %68 : vector<1x2x32xf32> to vector<2x32xf32>
    %70 = vector.shape_cast %67 : vector<2x32xf32> to vector<1x2x32xf32>
    tpu.vector_store %arg10[%c0_34, %c0_35, %c0_36], %70 {strides = array<i32>} : memref<1x2x32xf32, #tpu.memory_space<vmem>>, vector<1x2x32xf32>,
    return
  }
  func.func @transform_0(%arg0: i32) -> (i32, i32, i32) {
    %c0_i32 = arith.constant 0 : i32
    %c0_i32_0 = arith.constant 0 : i32
    %c0_i32_1 = arith.constant 0 : i32
    return %arg0, %c0_i32, %c0_i32_0 : i32, i32, i32
  }
  func.func @transform_1(%arg0: i32) -> (i32, i32, i32) {
    %c0_i32 = arith.constant 0 : i32
    %c0_i32_0 = arith.constant 0 : i32
    %c0_i32_1 = arith.constant 0 : i32
    return %arg0, %c0_i32, %c0_i32_0 : i32, i32, i32
  }
  func.func @transform_2(%arg0: i32) -> (i32, i32, i32) {
    %c0_i32 = arith.constant 0 : i32
    %c0_i32_0 = arith.constant 0 : i32
    %c0_i32_1 = arith.constant 0 : i32
    return %arg0, %c0_i32, %c0_i32_0 : i32, i32, i32
  }
  func.func @transform_3(%arg0: i32) -> (i32, i32, i32) {
    %c0_i32 = arith.constant 0 : i32
    %c0_i32_0 = arith.constant 0 : i32
    %c0_i32_1 = arith.constant 0 : i32
    return %arg0, %c0_i32, %c0_i32_0 : i32, i32, i32
  }
  func.func @transform_4(%arg0: i32) -> (i32, i32, i32) {
    %c0_i32 = arith.constant 0 : i32
    %c0_i32_0 = arith.constant 0 : i32
    %c0_i32_1 = arith.constant 0 : i32
    return %arg0, %c0_i32, %c0_i32_0 : i32, i32, i32
  }
  func.func @transform_5(%arg0: i32) -> (i32, i32, i32) {
    %c0_i32 = arith.constant 0 : i32
    %c0_i32_0 = arith.constant 0 : i32
    %c0_i32_1 = arith.constant 0 : i32
    return %arg0, %c0_i32, %c0_i32_0 : i32, i32, i32
  }
  func.func @transform_6(%arg0: i32) -> (i32, i32, i32) {
    %c0_i32 = arith.constant 0 : i32
    %c0_i32_0 = arith.constant 0 : i32
    %c0_i32_1 = arith.constant 0 : i32
    return %arg0, %c0_i32, %c0_i32_0 : i32, i32, i32
  }
  func.func @transform_7(%arg0: i32) -> (i32, i32, i32) {
    %c0_i32 = arith.constant 0 : i32
    %c0_i32_0 = arith.constant 0 : i32
    %c0_i32_1 = arith.constant 0 : i32
    return %arg0, %c0_i32, %c0_i32_0 : i32, i32, i32
  }
  func.func @transform_8(%arg0: i32) -> (i32, i32, i32) {
    %c0_i32 = arith.constant 0 : i32
    %c0_i32_0 = arith.constant 0 : i32
    %c0_i32_1 = arith.constant 0 : i32
    return %arg0, %c0_i32, %c0_i32_0 : i32, i32, i32
  }
  func.func @transform_9(%arg0: i32) -> (i32, i32, i32) {
    %c0_i32 = arith.constant 0 : i32
    %c0_i32_0 = arith.constant 0 : i32
    %c0_i32_1 = arith.constant 0 : i32
    return %arg0, %c0_i32, %c0_i32_0 : i32, i32, i32
  }
}

module attributes {stable_mosaic.version = 11 : i64} {
  func.func @tx_kernel(%arg0: i32, %arg1: i32, %arg2: memref<8x32xf32, #tpu.memory_space<vmem>>, %arg3: memref<1x1x32xf32, #tpu.memory_space<vmem>>, %arg4: memref<1x1x32xf32, #tpu.memory_space<vmem>>, %arg5: memref<1x32x96xbf16, #tpu.memory_space<vmem>>, %arg6: memref<1x32x32xbf16, #tpu.memory_space<vmem>>, %arg7: memref<1x1x32xf32, #tpu.memory_space<vmem>>, %arg8: memref<1x1x32xf32, #tpu.memory_space<vmem>>, %arg9: memref<1x1x32xf32, #tpu.memory_space<vmem>>, %arg10: memref<1x32x64xbf16, #tpu.memory_space<vmem>>, %arg11: memref<1x1x64xf32, #tpu.memory_space<vmem>>, %arg12: memref<1x64x32xbf16, #tpu.memory_space<vmem>>, %arg13: memref<1x1x32xf32, #tpu.memory_space<vmem>>, %arg14: memref<8x32xf32, #tpu.memory_space<vmem>>) attributes {dimension_semantics = [#tpu.dimension_semantics<parallel>, #tpu.dimension_semantics<arbitrary>], iteration_bounds = array<i64: 2, 2>, scalar_prefetch = 0 : i64, scratch_operands = 0 : i64, tpu.core_type = #tpu.core_type<tc>, window_params = [{transform_indices = @transform_0, window_bounds = array<i64: 8, 32>}, {transform_indices = @transform_1, window_bounds = array<i64: 1, 1, 32>}, {transform_indices = @transform_2, window_bounds = array<i64: 1, 1, 32>}, {transform_indices = @transform_3, window_bounds = array<i64: 1, 32, 96>}, {transform_indices = @transform_4, window_bounds = array<i64: 1, 32, 32>}, {transform_indices = @transform_5, window_bounds = array<i64: 1, 1, 32>}, {transform_indices = @transform_6, window_bounds = array<i64: 1, 1, 32>}, {transform_indices = @transform_7, window_bounds = array<i64: 1, 1, 32>}, {transform_indices = @transform_8, window_bounds = array<i64: 1, 32, 64>}, {transform_indices = @transform_9, window_bounds = array<i64: 1, 1, 64>}, {transform_indices = @transform_10, window_bounds = array<i64: 1, 64, 32>}, {transform_indices = @transform_11, window_bounds = array<i64: 1, 1, 32>}, {transform_indices = @transform_12, window_bounds = array<i64: 8, 32>}]} {
    %c0_i32 = arith.constant 0 : i32
    %0 = arith.cmpi eq, %arg1, %c0_i32 : i32
    %1 = arith.extui %0 : i1 to i32
    %c0_i32_0 = arith.constant 0 : i32
    %2 = arith.cmpi ne, %1, %c0_i32_0 : i32
    scf.if %2 {
      %c0_76 = arith.constant 0 : index
      %c0_77 = arith.constant 0 : index
      %218 = vector.load %arg2[%c0_76, %c0_77] : memref<8x32xf32, #tpu.memory_space<vmem>>, vector<8x32xf32>
      %c0_78 = arith.constant 0 : index
      %c0_79 = arith.constant 0 : index
      %219 = vector.load %arg14[%c0_78, %c0_79] : memref<8x32xf32, #tpu.memory_space<vmem>>, vector<8x32xf32>
      tpu.vector_store %arg14[%c0_78, %c0_79], %218 {strides = array<i32>} : memref<8x32xf32, #tpu.memory_space<vmem>>, vector<8x32xf32>,
    } else {
    }
    %c0 = arith.constant 0 : index
    %c0_1 = arith.constant 0 : index
    %3 = vector.load %arg14[%c0, %c0_1] : memref<8x32xf32, #tpu.memory_space<vmem>>, vector<8x32xf32>
    %4 = tpu.iota {dimensions = array<i32: 1>} : vector<1x8xi32>
    %c4_i32 = arith.constant 4 : i32
    %5 = vector.broadcast %c4_i32 : i32 to vector<1x8xi32>
    %6 = arith.cmpi slt, %4, %5 : vector<1x8xi32>
    %cst = arith.constant 0.000000e+00 : f32
    %cst_2 = arith.constant -1.000000e+30 : f32
    %7 = vector.broadcast %cst : f32 to vector<1x8xf32>
    %8 = vector.broadcast %cst_2 : f32 to vector<1x8xf32>
    %9 = arith.select %6, %7, %8 : vector<1x8xi1>, vector<1x8xf32>
    %c0_3 = arith.constant 0 : index
    %c0_4 = arith.constant 0 : index
    %c0_5 = arith.constant 0 : index
    %10 = vector.load %arg3[%c0_3, %c0_4, %c0_5] : memref<1x1x32xf32, #tpu.memory_space<vmem>>, vector<1x1x32xf32>
    %11 = vector.shape_cast %10 : vector<1x1x32xf32> to vector<1x32xf32>
    %c0_6 = arith.constant 0 : index
    %c0_7 = arith.constant 0 : index
    %c0_8 = arith.constant 0 : index
    %12 = vector.load %arg4[%c0_6, %c0_7, %c0_8] : memref<1x1x32xf32, #tpu.memory_space<vmem>>, vector<1x1x32xf32>
    %13 = vector.shape_cast %12 : vector<1x1x32xf32> to vector<1x32xf32>
    %cst_9 = arith.constant dense<0.000000e+00> : vector<8xf32>
    %14 = vector.multi_reduction <add>, %3, %cst_9 [1] : vector<8x32xf32> to vector<8xf32>
    %15 = vector.shape_cast %14 : vector<8xf32> to vector<8x1xf32>
    %cst_10 = arith.constant 3.200000e+01 : f32
    %16 = vector.broadcast %cst_10 : f32 to vector<8x1xf32>
    %17 = arith.divf %15, %16 : vector<8x1xf32>
    %18 = vector.broadcast %17 : vector<8x1xf32> to vector<8x32xf32>
    %19 = arith.subf %3, %18 : vector<8x32xf32>
    %20 = arith.mulf %19, %19 : vector<8x32xf32>
    %cst_11 = arith.constant dense<0.000000e+00> : vector<8xf32>
    %21 = vector.multi_reduction <add>, %20, %cst_11 [1] : vector<8x32xf32> to vector<8xf32>
    %22 = vector.shape_cast %21 : vector<8xf32> to vector<8x1xf32>
    %cst_12 = arith.constant 3.200000e+01 : f32
    %23 = vector.broadcast %cst_12 : f32 to vector<8x1xf32>
    %24 = arith.divf %22, %23 : vector<8x1xf32>
    %25 = vector.broadcast %17 : vector<8x1xf32> to vector<8x32xf32>
    %26 = arith.subf %3, %25 : vector<8x32xf32>
    %cst_13 = arith.constant 9.99999974E-6 : f32
    %27 = vector.broadcast %cst_13 : f32 to vector<8x1xf32>
    %28 = arith.addf %24, %27 : vector<8x1xf32>
    %29 = math.rsqrt %28 : vector<8x1xf32>
    %30 = vector.broadcast %29 : vector<8x1xf32> to vector<8x32xf32>
    %31 = arith.mulf %26, %30 : vector<8x32xf32>
    %32 = vector.broadcast %11 : vector<1x32xf32> to vector<8x32xf32>
    %33 = arith.mulf %31, %32 : vector<8x32xf32>
    %34 = vector.broadcast %13 : vector<1x32xf32> to vector<8x32xf32>
    %35 = arith.addf %33, %34 : vector<8x32xf32>
    %36 = arith.truncf %35 : vector<8x32xf32> to vector<8x32xbf16>
    %c0_14 = arith.constant 0 : index
    %c0_15 = arith.constant 0 : index
    %c0_16 = arith.constant 0 : index
    %37 = vector.load %arg5[%c0_14, %c0_15, %c0_16] : memref<1x32x96xbf16, #tpu.memory_space<vmem>>, vector<1x32x96xbf16>
    %38 = vector.shape_cast %37 : vector<1x32x96xbf16> to vector<32x96xbf16>
    %cst_17 = arith.constant dense<0.000000e+00> : vector<8x96xf32>
    %39 = tpu.matmul %36, %38, %cst_17 {dimension_numbers = #tpu.dot_dimension_numbers<[1], [0], [0], [1], [0, 0, 1, 1], [], []>} : vector<8x32xbf16>, vector<32x96xbf16>, vector<8x96xf32> -> vector<8x96xf32>
    %40 = vector.extract_strided_slice %39 {offsets = [0, 0], sizes = [8, 32], strides = [1, 1]} : vector<8x96xf32> to vector<8x32xf32>
    %41 = vector.extract_strided_slice %39 {offsets = [0, 32], sizes = [8, 32], strides = [1, 1]} : vector<8x96xf32> to vector<8x32xf32>
    %42 = vector.extract_strided_slice %39 {offsets = [0, 64], sizes = [8, 32], strides = [1, 1]} : vector<8x96xf32> to vector<8x32xf32>
    %43 = vector.extract_strided_slice %40 {offsets = [0, 0], sizes = [8, 8], strides = [1, 1]} : vector<8x32xf32> to vector<8x8xf32>
    %44 = vector.shape_cast %43 : vector<8x8xf32> to vector<1x8x8xf32>
    %45 = vector.extract_strided_slice %41 {offsets = [0, 0], sizes = [8, 8], strides = [1, 1]} : vector<8x32xf32> to vector<8x8xf32>
    %46 = vector.shape_cast %45 : vector<8x8xf32> to vector<1x8x8xf32>
    %47 = vector.extract_strided_slice %42 {offsets = [0, 0], sizes = [8, 8], strides = [1, 1]} : vector<8x32xf32> to vector<8x8xf32>
    %48 = vector.shape_cast %47 : vector<8x8xf32> to vector<1x8x8xf32>
    %49 = arith.truncf %44 : vector<1x8x8xf32> to vector<1x8x8xbf16>
    %50 = arith.truncf %46 : vector<1x8x8xf32> to vector<1x8x8xbf16>
    "tpu.trace_start"() <{level = 10 : i32, message = "bnd,bmd->bnm"}> : () -> ()
    %cst_18 = arith.constant dense<0.000000e+00> : vector<1x8x8xf32>
    %51 = tpu.matmul %49, %50, %cst_18 {dimension_numbers = #tpu.dot_dimension_numbers<[2], [2], [1], [1], [0, 0, 0, 1, 1, 1], [0], [0]>} : vector<1x8x8xbf16>, vector<1x8x8xbf16>, vector<1x8x8xf32> -> vector<1x8x8xf32>
    "tpu.trace_stop"() : () -> ()
    %cst_19 = arith.constant 0.353553385 : f32
    %52 = vector.broadcast %cst_19 : f32 to vector<1x8x8xf32>
    %53 = arith.mulf %51, %52 : vector<1x8x8xf32>
    %54 = vector.shape_cast %9 : vector<1x8xf32> to vector<1x1x8xf32>
    %55 = vector.broadcast %54 : vector<1x1x8xf32> to vector<1x8x8xf32>
    %56 = arith.addf %53, %55 : vector<1x8x8xf32>
    %cst_20 = arith.constant dense<0xFF800000> : vector<1x8xf32>
    %57 = vector.multi_reduction <maximumf>, %56, %cst_20 [2] : vector<1x8x8xf32> to vector<1x8xf32>
    %58 = vector.shape_cast %57 : vector<1x8xf32> to vector<1x8x1xf32>
    %59 = vector.broadcast %58 : vector<1x8x1xf32> to vector<1x8x8xf32>
    %60 = arith.subf %56, %59 : vector<1x8x8xf32>
    %61 = math.exp %60 : vector<1x8x8xf32>
    %cst_21 = arith.constant dense<0.000000e+00> : vector<1x8xf32>
    %62 = vector.multi_reduction <add>, %61, %cst_21 [2] : vector<1x8x8xf32> to vector<1x8xf32>
    %63 = vector.shape_cast %62 : vector<1x8xf32> to vector<1x8x1xf32>
    %64 = vector.broadcast %63 : vector<1x8x1xf32> to vector<1x8x8xf32>
    %65 = arith.divf %61, %64 : vector<1x8x8xf32>
    %66 = arith.truncf %65 : vector<1x8x8xf32> to vector<1x8x8xbf16>
    %67 = arith.truncf %48 : vector<1x8x8xf32> to vector<1x8x8xbf16>
    "tpu.trace_start"() <{level = 10 : i32, message = "bnm,bmd->bnd"}> : () -> ()
    %cst_22 = arith.constant dense<0.000000e+00> : vector<1x8x8xf32>
    %68 = tpu.matmul %66, %67, %cst_22 {dimension_numbers = #tpu.dot_dimension_numbers<[2], [1], [1], [2], [0, 0, 0, 1, 1, 2], [0], [0]>} : vector<1x8x8xbf16>, vector<1x8x8xbf16>, vector<1x8x8xf32> -> vector<1x8x8xf32>
    "tpu.trace_stop"() : () -> ()
    %69 = vector.shape_cast %68 : vector<1x8x8xf32> to vector<8x8xf32>
    %70 = vector.extract_strided_slice %40 {offsets = [0, 8], sizes = [8, 8], strides = [1, 1]} : vector<8x32xf32> to vector<8x8xf32>
    %71 = vector.shape_cast %70 : vector<8x8xf32> to vector<1x8x8xf32>
    %72 = vector.extract_strided_slice %41 {offsets = [0, 8], sizes = [8, 8], strides = [1, 1]} : vector<8x32xf32> to vector<8x8xf32>
    %73 = vector.shape_cast %72 : vector<8x8xf32> to vector<1x8x8xf32>
    %74 = vector.extract_strided_slice %42 {offsets = [0, 8], sizes = [8, 8], strides = [1, 1]} : vector<8x32xf32> to vector<8x8xf32>
    %75 = vector.shape_cast %74 : vector<8x8xf32> to vector<1x8x8xf32>
    %76 = arith.truncf %71 : vector<1x8x8xf32> to vector<1x8x8xbf16>
    %77 = arith.truncf %73 : vector<1x8x8xf32> to vector<1x8x8xbf16>
    "tpu.trace_start"() <{level = 10 : i32, message = "bnd,bmd->bnm"}> : () -> ()
    %cst_23 = arith.constant dense<0.000000e+00> : vector<1x8x8xf32>
    %78 = tpu.matmul %76, %77, %cst_23 {dimension_numbers = #tpu.dot_dimension_numbers<[2], [2], [1], [1], [0, 0, 0, 1, 1, 1], [0], [0]>} : vector<1x8x8xbf16>, vector<1x8x8xbf16>, vector<1x8x8xf32> -> vector<1x8x8xf32>
    "tpu.trace_stop"() : () -> ()
    %cst_24 = arith.constant 0.353553385 : f32
    %79 = vector.broadcast %cst_24 : f32 to vector<1x8x8xf32>
    %80 = arith.mulf %78, %79 : vector<1x8x8xf32>
    %81 = vector.shape_cast %9 : vector<1x8xf32> to vector<1x1x8xf32>
    %82 = vector.broadcast %81 : vector<1x1x8xf32> to vector<1x8x8xf32>
    %83 = arith.addf %80, %82 : vector<1x8x8xf32>
    %cst_25 = arith.constant dense<0xFF800000> : vector<1x8xf32>
    %84 = vector.multi_reduction <maximumf>, %83, %cst_25 [2] : vector<1x8x8xf32> to vector<1x8xf32>
    %85 = vector.shape_cast %84 : vector<1x8xf32> to vector<1x8x1xf32>
    %86 = vector.broadcast %85 : vector<1x8x1xf32> to vector<1x8x8xf32>
    %87 = arith.subf %83, %86 : vector<1x8x8xf32>
    %88 = math.exp %87 : vector<1x8x8xf32>
    %cst_26 = arith.constant dense<0.000000e+00> : vector<1x8xf32>
    %89 = vector.multi_reduction <add>, %88, %cst_26 [2] : vector<1x8x8xf32> to vector<1x8xf32>
    %90 = vector.shape_cast %89 : vector<1x8xf32> to vector<1x8x1xf32>
    %91 = vector.broadcast %90 : vector<1x8x1xf32> to vector<1x8x8xf32>
    %92 = arith.divf %88, %91 : vector<1x8x8xf32>
    %93 = arith.truncf %92 : vector<1x8x8xf32> to vector<1x8x8xbf16>
    %94 = arith.truncf %75 : vector<1x8x8xf32> to vector<1x8x8xbf16>
    "tpu.trace_start"() <{level = 10 : i32, message = "bnm,bmd->bnd"}> : () -> ()
    %cst_27 = arith.constant dense<0.000000e+00> : vector<1x8x8xf32>
    %95 = tpu.matmul %93, %94, %cst_27 {dimension_numbers = #tpu.dot_dimension_numbers<[2], [1], [1], [2], [0, 0, 0, 1, 1, 2], [0], [0]>} : vector<1x8x8xbf16>, vector<1x8x8xbf16>, vector<1x8x8xf32> -> vector<1x8x8xf32>
    "tpu.trace_stop"() : () -> ()
    %96 = vector.shape_cast %95 : vector<1x8x8xf32> to vector<8x8xf32>
    %97 = vector.extract_strided_slice %40 {offsets = [0, 16], sizes = [8, 8], strides = [1, 1]} : vector<8x32xf32> to vector<8x8xf32>
    %98 = vector.shape_cast %97 : vector<8x8xf32> to vector<1x8x8xf32>
    %99 = vector.extract_strided_slice %41 {offsets = [0, 16], sizes = [8, 8], strides = [1, 1]} : vector<8x32xf32> to vector<8x8xf32>
    %100 = vector.shape_cast %99 : vector<8x8xf32> to vector<1x8x8xf32>
    %101 = vector.extract_strided_slice %42 {offsets = [0, 16], sizes = [8, 8], strides = [1, 1]} : vector<8x32xf32> to vector<8x8xf32>
    %102 = vector.shape_cast %101 : vector<8x8xf32> to vector<1x8x8xf32>
    %103 = arith.truncf %98 : vector<1x8x8xf32> to vector<1x8x8xbf16>
    %104 = arith.truncf %100 : vector<1x8x8xf32> to vector<1x8x8xbf16>
    "tpu.trace_start"() <{level = 10 : i32, message = "bnd,bmd->bnm"}> : () -> ()
    %cst_28 = arith.constant dense<0.000000e+00> : vector<1x8x8xf32>
    %105 = tpu.matmul %103, %104, %cst_28 {dimension_numbers = #tpu.dot_dimension_numbers<[2], [2], [1], [1], [0, 0, 0, 1, 1, 1], [0], [0]>} : vector<1x8x8xbf16>, vector<1x8x8xbf16>, vector<1x8x8xf32> -> vector<1x8x8xf32>
    "tpu.trace_stop"() : () -> ()
    %cst_29 = arith.constant 0.353553385 : f32
    %106 = vector.broadcast %cst_29 : f32 to vector<1x8x8xf32>
    %107 = arith.mulf %105, %106 : vector<1x8x8xf32>
    %108 = vector.shape_cast %9 : vector<1x8xf32> to vector<1x1x8xf32>
    %109 = vector.broadcast %108 : vector<1x1x8xf32> to vector<1x8x8xf32>
    %110 = arith.addf %107, %109 : vector<1x8x8xf32>
    %cst_30 = arith.constant dense<0xFF800000> : vector<1x8xf32>
    %111 = vector.multi_reduction <maximumf>, %110, %cst_30 [2] : vector<1x8x8xf32> to vector<1x8xf32>
    %112 = vector.shape_cast %111 : vector<1x8xf32> to vector<1x8x1xf32>
    %113 = vector.broadcast %112 : vector<1x8x1xf32> to vector<1x8x8xf32>
    %114 = arith.subf %110, %113 : vector<1x8x8xf32>
    %115 = math.exp %114 : vector<1x8x8xf32>
    %cst_31 = arith.constant dense<0.000000e+00> : vector<1x8xf32>
    %116 = vector.multi_reduction <add>, %115, %cst_31 [2] : vector<1x8x8xf32> to vector<1x8xf32>
    %117 = vector.shape_cast %116 : vector<1x8xf32> to vector<1x8x1xf32>
    %118 = vector.broadcast %117 : vector<1x8x1xf32> to vector<1x8x8xf32>
    %119 = arith.divf %115, %118 : vector<1x8x8xf32>
    %120 = arith.truncf %119 : vector<1x8x8xf32> to vector<1x8x8xbf16>
    %121 = arith.truncf %102 : vector<1x8x8xf32> to vector<1x8x8xbf16>
    "tpu.trace_start"() <{level = 10 : i32, message = "bnm,bmd->bnd"}> : () -> ()
    %cst_32 = arith.constant dense<0.000000e+00> : vector<1x8x8xf32>
    %122 = tpu.matmul %120, %121, %cst_32 {dimension_numbers = #tpu.dot_dimension_numbers<[2], [1], [1], [2], [0, 0, 0, 1, 1, 2], [0], [0]>} : vector<1x8x8xbf16>, vector<1x8x8xbf16>, vector<1x8x8xf32> -> vector<1x8x8xf32>
    "tpu.trace_stop"() : () -> ()
    %123 = vector.shape_cast %122 : vector<1x8x8xf32> to vector<8x8xf32>
    %124 = vector.extract_strided_slice %40 {offsets = [0, 24], sizes = [8, 8], strides = [1, 1]} : vector<8x32xf32> to vector<8x8xf32>
    %125 = vector.shape_cast %124 : vector<8x8xf32> to vector<1x8x8xf32>
    %126 = vector.extract_strided_slice %41 {offsets = [0, 24], sizes = [8, 8], strides = [1, 1]} : vector<8x32xf32> to vector<8x8xf32>
    %127 = vector.shape_cast %126 : vector<8x8xf32> to vector<1x8x8xf32>
    %128 = vector.extract_strided_slice %42 {offsets = [0, 24], sizes = [8, 8], strides = [1, 1]} : vector<8x32xf32> to vector<8x8xf32>
    %129 = vector.shape_cast %128 : vector<8x8xf32> to vector<1x8x8xf32>
    %130 = arith.truncf %125 : vector<1x8x8xf32> to vector<1x8x8xbf16>
    %131 = arith.truncf %127 : vector<1x8x8xf32> to vector<1x8x8xbf16>
    "tpu.trace_start"() <{level = 10 : i32, message = "bnd,bmd->bnm"}> : () -> ()
    %cst_33 = arith.constant dense<0.000000e+00> : vector<1x8x8xf32>
    %132 = tpu.matmul %130, %131, %cst_33 {dimension_numbers = #tpu.dot_dimension_numbers<[2], [2], [1], [1], [0, 0, 0, 1, 1, 1], [0], [0]>} : vector<1x8x8xbf16>, vector<1x8x8xbf16>, vector<1x8x8xf32> -> vector<1x8x8xf32>
    "tpu.trace_stop"() : () -> ()
    %cst_34 = arith.constant 0.353553385 : f32
    %133 = vector.broadcast %cst_34 : f32 to vector<1x8x8xf32>
    %134 = arith.mulf %132, %133 : vector<1x8x8xf32>
    %135 = vector.shape_cast %9 : vector<1x8xf32> to vector<1x1x8xf32>
    %136 = vector.broadcast %135 : vector<1x1x8xf32> to vector<1x8x8xf32>
    %137 = arith.addf %134, %136 : vector<1x8x8xf32>
    %cst_35 = arith.constant dense<0xFF800000> : vector<1x8xf32>
    %138 = vector.multi_reduction <maximumf>, %137, %cst_35 [2] : vector<1x8x8xf32> to vector<1x8xf32>
    %139 = vector.shape_cast %138 : vector<1x8xf32> to vector<1x8x1xf32>
    %140 = vector.broadcast %139 : vector<1x8x1xf32> to vector<1x8x8xf32>
    %141 = arith.subf %137, %140 : vector<1x8x8xf32>
    %142 = math.exp %141 : vector<1x8x8xf32>
    %cst_36 = arith.constant dense<0.000000e+00> : vector<1x8xf32>
    %143 = vector.multi_reduction <add>, %142, %cst_36 [2] : vector<1x8x8xf32> to vector<1x8xf32>
    %144 = vector.shape_cast %143 : vector<1x8xf32> to vector<1x8x1xf32>
    %145 = vector.broadcast %144 : vector<1x8x1xf32> to vector<1x8x8xf32>
    %146 = arith.divf %142, %145 : vector<1x8x8xf32>
    %147 = arith.truncf %146 : vector<1x8x8xf32> to vector<1x8x8xbf16>
    %148 = arith.truncf %129 : vector<1x8x8xf32> to vector<1x8x8xbf16>
    "tpu.trace_start"() <{level = 10 : i32, message = "bnm,bmd->bnd"}> : () -> ()
    %cst_37 = arith.constant dense<0.000000e+00> : vector<1x8x8xf32>
    %149 = tpu.matmul %147, %148, %cst_37 {dimension_numbers = #tpu.dot_dimension_numbers<[2], [1], [1], [2], [0, 0, 0, 1, 1, 2], [0], [0]>} : vector<1x8x8xbf16>, vector<1x8x8xbf16>, vector<1x8x8xf32> -> vector<1x8x8xf32>
    "tpu.trace_stop"() : () -> ()
    %150 = vector.shape_cast %149 : vector<1x8x8xf32> to vector<8x8xf32>
    %151 = tpu.concatenate %69, %96, %123, %150 in 1 : vector<8x8xf32>, vector<8x8xf32>, vector<8x8xf32>, vector<8x8xf32> -> vector<8x32xf32>
    %152 = arith.truncf %151 : vector<8x32xf32> to vector<8x32xbf16>
    %c0_38 = arith.constant 0 : index
    %c0_39 = arith.constant 0 : index
    %c0_40 = arith.constant 0 : index
    %153 = vector.load %arg6[%c0_38, %c0_39, %c0_40] : memref<1x32x32xbf16, #tpu.memory_space<vmem>>, vector<1x32x32xbf16>
    %154 = vector.shape_cast %153 : vector<1x32x32xbf16> to vector<32x32xbf16>
    %cst_41 = arith.constant dense<0.000000e+00> : vector<8x32xf32>
    %155 = tpu.matmul %152, %154, %cst_41 {dimension_numbers = #tpu.dot_dimension_numbers<[1], [0], [0], [1], [0, 0, 1, 1], [], []>} : vector<8x32xbf16>, vector<32x32xbf16>, vector<8x32xf32> -> vector<8x32xf32>
    %c0_42 = arith.constant 0 : index
    %c0_43 = arith.constant 0 : index
    %c0_44 = arith.constant 0 : index
    %156 = vector.load %arg7[%c0_42, %c0_43, %c0_44] : memref<1x1x32xf32, #tpu.memory_space<vmem>>, vector<1x1x32xf32>
    %157 = vector.shape_cast %156 : vector<1x1x32xf32> to vector<1x32xf32>
    %158 = vector.broadcast %157 : vector<1x32xf32> to vector<8x32xf32>
    %159 = arith.addf %155, %158 : vector<8x32xf32>
    %160 = arith.addf %3, %159 : vector<8x32xf32>
    %c0_45 = arith.constant 0 : index
    %c0_46 = arith.constant 0 : index
    %c0_47 = arith.constant 0 : index
    %161 = vector.load %arg8[%c0_45, %c0_46, %c0_47] : memref<1x1x32xf32, #tpu.memory_space<vmem>>, vector<1x1x32xf32>
    %162 = vector.shape_cast %161 : vector<1x1x32xf32> to vector<1x32xf32>
    %c0_48 = arith.constant 0 : index
    %c0_49 = arith.constant 0 : index
    %c0_50 = arith.constant 0 : index
    %163 = vector.load %arg9[%c0_48, %c0_49, %c0_50] : memref<1x1x32xf32, #tpu.memory_space<vmem>>, vector<1x1x32xf32>
    %164 = vector.shape_cast %163 : vector<1x1x32xf32> to vector<1x32xf32>
    %cst_51 = arith.constant dense<0.000000e+00> : vector<8xf32>
    %165 = vector.multi_reduction <add>, %160, %cst_51 [1] : vector<8x32xf32> to vector<8xf32>
    %166 = vector.shape_cast %165 : vector<8xf32> to vector<8x1xf32>
    %cst_52 = arith.constant 3.200000e+01 : f32
    %167 = vector.broadcast %cst_52 : f32 to vector<8x1xf32>
    %168 = arith.divf %166, %167 : vector<8x1xf32>
    %169 = vector.broadcast %168 : vector<8x1xf32> to vector<8x32xf32>
    %170 = arith.subf %160, %169 : vector<8x32xf32>
    %171 = arith.mulf %170, %170 : vector<8x32xf32>
    %cst_53 = arith.constant dense<0.000000e+00> : vector<8xf32>
    %172 = vector.multi_reduction <add>, %171, %cst_53 [1] : vector<8x32xf32> to vector<8xf32>
    %173 = vector.shape_cast %172 : vector<8xf32> to vector<8x1xf32>
    %cst_54 = arith.constant 3.200000e+01 : f32
    %174 = vector.broadcast %cst_54 : f32 to vector<8x1xf32>
    %175 = arith.divf %173, %174 : vector<8x1xf32>
    %176 = vector.broadcast %168 : vector<8x1xf32> to vector<8x32xf32>
    %177 = arith.subf %160, %176 : vector<8x32xf32>
    %cst_55 = arith.constant 9.99999974E-6 : f32
    %178 = vector.broadcast %cst_55 : f32 to vector<8x1xf32>
    %179 = arith.addf %175, %178 : vector<8x1xf32>
    %180 = math.rsqrt %179 : vector<8x1xf32>
    %181 = vector.broadcast %180 : vector<8x1xf32> to vector<8x32xf32>
    %182 = arith.mulf %177, %181 : vector<8x32xf32>
    %183 = vector.broadcast %162 : vector<1x32xf32> to vector<8x32xf32>
    %184 = arith.mulf %182, %183 : vector<8x32xf32>
    %185 = vector.broadcast %164 : vector<1x32xf32> to vector<8x32xf32>
    %186 = arith.addf %184, %185 : vector<8x32xf32>
    %187 = arith.truncf %186 : vector<8x32xf32> to vector<8x32xbf16>
    %c0_56 = arith.constant 0 : index
    %c0_57 = arith.constant 0 : index
    %c0_58 = arith.constant 0 : index
    %188 = vector.load %arg10[%c0_56, %c0_57, %c0_58] : memref<1x32x64xbf16, #tpu.memory_space<vmem>>, vector<1x32x64xbf16>
    %189 = vector.shape_cast %188 : vector<1x32x64xbf16> to vector<32x64xbf16>
    %cst_59 = arith.constant dense<0.000000e+00> : vector<8x64xf32>
    %190 = tpu.matmul %187, %189, %cst_59 {dimension_numbers = #tpu.dot_dimension_numbers<[1], [0], [0], [1], [0, 0, 1, 1], [], []>} : vector<8x32xbf16>, vector<32x64xbf16>, vector<8x64xf32> -> vector<8x64xf32>
    %c0_60 = arith.constant 0 : index
    %c0_61 = arith.constant 0 : index
    %c0_62 = arith.constant 0 : index
    %191 = vector.load %arg11[%c0_60, %c0_61, %c0_62] : memref<1x1x64xf32, #tpu.memory_space<vmem>>, vector<1x1x64xf32>
    %192 = vector.shape_cast %191 : vector<1x1x64xf32> to vector<1x64xf32>
    %193 = vector.broadcast %192 : vector<1x64xf32> to vector<8x64xf32>
    %194 = arith.addf %190, %193 : vector<8x64xf32>
    %195 = arith.mulf %194, %194 : vector<8x64xf32>
    %196 = arith.mulf %194, %195 : vector<8x64xf32>
    %cst_63 = arith.constant 4.471500e-02 : f32
    %197 = vector.broadcast %cst_63 : f32 to vector<8x64xf32>
    %198 = arith.mulf %197, %196 : vector<8x64xf32>
    %199 = arith.addf %194, %198 : vector<8x64xf32>
    %cst_64 = arith.constant 0.797884583 : f32
    %200 = vector.broadcast %cst_64 : f32 to vector<8x64xf32>
    %201 = arith.mulf %200, %199 : vector<8x64xf32>
    %202 = math.tanh %201 : vector<8x64xf32>
    %cst_65 = arith.constant 1.000000e+00 : f32
    %203 = vector.broadcast %cst_65 : f32 to vector<8x64xf32>
    %204 = arith.addf %203, %202 : vector<8x64xf32>
    %cst_66 = arith.constant 5.000000e-01 : f32
    %205 = vector.broadcast %cst_66 : f32 to vector<8x64xf32>
    %206 = arith.mulf %205, %204 : vector<8x64xf32>
    %207 = arith.mulf %194, %206 : vector<8x64xf32>
    %208 = arith.truncf %207 : vector<8x64xf32> to vector<8x64xbf16>
    %c0_67 = arith.constant 0 : index
    %c0_68 = arith.constant 0 : index
    %c0_69 = arith.constant 0 : index
    %209 = vector.load %arg12[%c0_67, %c0_68, %c0_69] : memref<1x64x32xbf16, #tpu.memory_space<vmem>>, vector<1x64x32xbf16>
    %210 = vector.shape_cast %209 : vector<1x64x32xbf16> to vector<64x32xbf16>
    %cst_70 = arith.constant dense<0.000000e+00> : vector<8x32xf32>
    %211 = tpu.matmul %208, %210, %cst_70 {dimension_numbers = #tpu.dot_dimension_numbers<[1], [0], [0], [1], [0, 0, 1, 1], [], []>} : vector<8x64xbf16>, vector<64x32xbf16>, vector<8x32xf32> -> vector<8x32xf32>
    %c0_71 = arith.constant 0 : index
    %c0_72 = arith.constant 0 : index
    %c0_73 = arith.constant 0 : index
    %212 = vector.load %arg13[%c0_71, %c0_72, %c0_73] : memref<1x1x32xf32, #tpu.memory_space<vmem>>, vector<1x1x32xf32>
    %213 = vector.shape_cast %212 : vector<1x1x32xf32> to vector<1x32xf32>
    %214 = vector.broadcast %213 : vector<1x32xf32> to vector<8x32xf32>
    %215 = arith.addf %211, %214 : vector<8x32xf32>
    %216 = arith.addf %160, %215 : vector<8x32xf32>
    %c0_74 = arith.constant 0 : index
    %c0_75 = arith.constant 0 : index
    %217 = vector.load %arg14[%c0_74, %c0_75] : memref<8x32xf32, #tpu.memory_space<vmem>>, vector<8x32xf32>
    tpu.vector_store %arg14[%c0_74, %c0_75], %216 {strides = array<i32>} : memref<8x32xf32, #tpu.memory_space<vmem>>, vector<8x32xf32>,
    return
  }
  func.func @transform_0(%arg0: i32, %arg1: i32) -> (i32, i32) {
    %c0_i32 = arith.constant 0 : i32
    %c0_i32_0 = arith.constant 0 : i32
    return %arg0, %c0_i32 : i32, i32
  }
  func.func @transform_1(%arg0: i32, %arg1: i32) -> (i32, i32, i32) {
    %c0_i32 = arith.constant 0 : i32
    %c0_i32_0 = arith.constant 0 : i32
    %c0_i32_1 = arith.constant 0 : i32
    return %arg1, %c0_i32, %c0_i32_0 : i32, i32, i32
  }
  func.func @transform_2(%arg0: i32, %arg1: i32) -> (i32, i32, i32) {
    %c0_i32 = arith.constant 0 : i32
    %c0_i32_0 = arith.constant 0 : i32
    %c0_i32_1 = arith.constant 0 : i32
    return %arg1, %c0_i32, %c0_i32_0 : i32, i32, i32
  }
  func.func @transform_3(%arg0: i32, %arg1: i32) -> (i32, i32, i32) {
    %c0_i32 = arith.constant 0 : i32
    %c0_i32_0 = arith.constant 0 : i32
    %c0_i32_1 = arith.constant 0 : i32
    return %arg1, %c0_i32, %c0_i32_0 : i32, i32, i32
  }
  func.func @transform_4(%arg0: i32, %arg1: i32) -> (i32, i32, i32) {
    %c0_i32 = arith.constant 0 : i32
    %c0_i32_0 = arith.constant 0 : i32
    %c0_i32_1 = arith.constant 0 : i32
    return %arg1, %c0_i32, %c0_i32_0 : i32, i32, i32
  }
  func.func @transform_5(%arg0: i32, %arg1: i32) -> (i32, i32, i32) {
    %c0_i32 = arith.constant 0 : i32
    %c0_i32_0 = arith.constant 0 : i32
    %c0_i32_1 = arith.constant 0 : i32
    return %arg1, %c0_i32, %c0_i32_0 : i32, i32, i32
  }
  func.func @transform_6(%arg0: i32, %arg1: i32) -> (i32, i32, i32) {
    %c0_i32 = arith.constant 0 : i32
    %c0_i32_0 = arith.constant 0 : i32
    %c0_i32_1 = arith.constant 0 : i32
    return %arg1, %c0_i32, %c0_i32_0 : i32, i32, i32
  }
  func.func @transform_7(%arg0: i32, %arg1: i32) -> (i32, i32, i32) {
    %c0_i32 = arith.constant 0 : i32
    %c0_i32_0 = arith.constant 0 : i32
    %c0_i32_1 = arith.constant 0 : i32
    return %arg1, %c0_i32, %c0_i32_0 : i32, i32, i32
  }
  func.func @transform_8(%arg0: i32, %arg1: i32) -> (i32, i32, i32) {
    %c0_i32 = arith.constant 0 : i32
    %c0_i32_0 = arith.constant 0 : i32
    %c0_i32_1 = arith.constant 0 : i32
    return %arg1, %c0_i32, %c0_i32_0 : i32, i32, i32
  }
  func.func @transform_9(%arg0: i32, %arg1: i32) -> (i32, i32, i32) {
    %c0_i32 = arith.constant 0 : i32
    %c0_i32_0 = arith.constant 0 : i32
    %c0_i32_1 = arith.constant 0 : i32
    return %arg1, %c0_i32, %c0_i32_0 : i32, i32, i32
  }
  func.func @transform_10(%arg0: i32, %arg1: i32) -> (i32, i32, i32) {
    %c0_i32 = arith.constant 0 : i32
    %c0_i32_0 = arith.constant 0 : i32
    %c0_i32_1 = arith.constant 0 : i32
    return %arg1, %c0_i32, %c0_i32_0 : i32, i32, i32
  }
  func.func @transform_11(%arg0: i32, %arg1: i32) -> (i32, i32, i32) {
    %c0_i32 = arith.constant 0 : i32
    %c0_i32_0 = arith.constant 0 : i32
    %c0_i32_1 = arith.constant 0 : i32
    return %arg1, %c0_i32, %c0_i32_0 : i32, i32, i32
  }
  func.func @transform_12(%arg0: i32, %arg1: i32) -> (i32, i32) {
    %c0_i32 = arith.constant 0 : i32
    %c0_i32_0 = arith.constant 0 : i32
    return %arg0, %c0_i32 : i32, i32
  }
}

</mosaic_0001>

<bundles_post_ra>
// kernel: vit_forward.3
= control target key start
LH: loop header
LB: loop body
LE: loop exit
PB: predicated region body
PF: predicated region fallthrough
CT: control target
= control target key end

     0   :  { %s790_s30 = smov 0   ;;  %s861_s0 = inlined_call_operand.vmem [shape: f32[3,2,8], index: 0, kind: input, shape index: {}]   ;;  %s862_s1 = inlined_call_operand.vmem [shape: f32[3,1,8], index: 1, kind: input, shape index: {}]   ;;  %s863_s2 = inlined_call_operand.vmem [shape: f32[3,1,1], index: 2, kind: input, shape index: {}]   ;;  %s864_s3 = inlined_call_operand.vmem [shape: f32[3,1,8], index: 3, kind: input, shape index: {}]   ;;  %s865_s4 = inlined_call_operand.vmem [shape: f32[3,1,8], index: 4, kind: input, shape index: {}]   ;;  %s866_s5 = inlined_call_operand.vmem [shape: bf16[3,8,32], index: 5, kind: input, shape index: {}]   ;;  %s867_s6 = inlined_call_operand.vmem [shape: f32[3,1,32], index: 6, kind: input, shape index: {}]   ;;  %s868_s7 = inlined_call_operand.vmem [shape: f32[3,1,32], index: 7, kind: input, shape index: {}]   ;;  %s869_s8 = inlined_call_operand.vmem [shape: f32[3,1,32], index: 8, kind: input, shape index: {}]   ;;  %s870_s9 = inlined_call_operand.vmem [shape: f32[3,2,32], index: 9, kind: output, shape index: {}]  }
   0x1 LB: > { %s694_s10 = sadd.s32 4294967295, %s736_s30   ;;  %p698_p0 = scmp.ge.s32.totalorder %s736_s30, 1  ;;  %s736_s30 = sphi %s790_s30, %s19_s30  }
   0x2   : > { %p351_p1 = scmp.lt.s32.totalorder %s736_s30, 4 }
   0x4   : > { %p352_p2 = pnand %p698_p0, %p351_p1 }
   0x5   : > { %p410_p3 = scmp.lt.s32.totalorder (!%p352_p2), %s694_s10, 2 }
   0x6   : > { %355 = sbr.rel (%p352_p2) target bundleno = 916 (0x394), region = 56 }
   0xb   : > { %s872_s10 = smov (!%p410_p3, %s694_s10), 2  ;;  %vm451_vm0 = vcmask 58368   ;;  %v738_v4 = vmov 0   ;;  %vm508_vm4 = vcmask 1043456   ;;  %vm504_vm5 = vcmask 64512  }
   0xc   : > { %s699_s11 = sshll.u32 %s872_s10, 1  ;;  %s416_s14 = scalar_lea.vmem %s862_s1, %s872_s10  ;;  %715 = vset.pattern.permute.xlu0 %v738_v4  ;;  %716 = vset.pattern.permute.xlu1 %v738_v4  ;;  %vm525_vm6 = vcmask 254976   ;;  %v739_v37 = vmov 32.0  }
   0xd   : > { %s413_s17 = scalar_lea.vmem %s861_s0, %s699_s11  ;;  %v717_v0 = vld [vmem:[%s416_s14] ss:$0 sm:$0xff]  ;;  %s419_s20 = scalar_lea.vmem %s863_s2, %s872_s10 }
   0xe   : > { %v444_v1 = vld [vmem:[%s413_s17] sm:$0x3]  ;;  %s422_s23 = scalar_lea.vmem %s864_s3, %s872_s10  ;;  %s425_s26 = scalar_lea.vmem %s865_s4, %s872_s10 }
   0xf   : > { %v450_v2 = vmul.f32 %v717_v0, %v444_v1  ;;  %v718_v5 = vld [vmem:[%s419_s20] ss:$0 sm:$0xff]  ;;  %s432_s29 = scalar_lea.vmem %s867_s6, %s872_s10  ;;  %s700_s12 = sshll.u32 %s872_s10, 2 }
  0x10   : > { %s429_s15 = scalar_lea.vmem %s866_s5, %s700_s12  ;;  %v719_v25 = vld [vmem:[%s422_s23] ss:$0 sm:$0xff]  ;;  %s435_s18 = scalar_lea.vmem %s868_s7, %s872_s10 }
  0x11   : > { %v452_v3 = vsel %vm451_vm0, %v450_v2, 0.0  ;;  %v499_v23 = vld [vmem:[%s429_s15] sm:$0xf]  ;;  %s438_s21 = scalar_lea.vmem %s869_s8, %s872_s10  ;;  %s442_s28 = scalar_lea.vmem %s870_s9, %s699_s11 }
  0x12   : > { %453 = vadd.xlane.f32.xlu0 %v452_v3  ;;  %v510_v24 = vsel %vm508_vm4, %v499_v23, 0  ;;  %v720_v28 = vld [vmem:[%s425_s26] ss:$0 sm:$0xff] }
  0x13   : > { %519 = vmatpush.bf16.msra.mxu0 %v510_v24  ;;  %v721_v32 = vld [vmem:[%s432_s29] ss:$0 sm:$0xff] }
  0x14   : > { %v722_v58 = vld [vmem:[%s435_s18] ss:$0 sm:$0xff] }
  0x15   : > { %v723_v60 = vld [vmem:[%s438_s21] ss:$0 sm:$0xff] }
  0x85   : > { %v454_v6 = vpop.xlane.xlu0 %453 }
  0x86   : > { %v458_v7 = vmul.f32 %v718_v5, %v454_v6 }
  0x88   : > { %461 = vperm.xlu0 %715, %v458_v7  }
  0xfa   : > { %v462_v8 = vpop.permute.xlu0 %461 }
  0xfb   : > { %v464_v9 = vsub.f32 %v444_v1, %v462_v8 }
  0xfd   : > { %v465_v10 = vmul.f32 %v717_v0, %v464_v9 }
  0xff   : > { %v466_v11 = vmul.f32 %v465_v10, %v465_v10 }
 0x101   : > { %v467_v12 = vsel %vm451_vm0, %v466_v11, 0.0 }
 0x102   : > { %468 = vadd.xlane.f32.xlu1 %v467_v12 }
 0x175   : > { %v469_v13 = vpop.xlane.xlu1 %468 }
 0x176   : > { %v470_v14 = vmul.f32 %v718_v5, %v469_v13 }
 0x178   : > { %v471_v15 = vadd.f32 1e-05, %v470_v14 }
 0x17a   : > { %724 = vrsqrt.f32 %v471_v15  ;;  %vm478_vm2 = vweird.f32 %v471_v15 }
 0x17b   : > { %726 = vrcp.f32 %v739_v37 }
 0x180   : > { %v725_v16 = vpop.eup %724 }
 0x181   : > { %v473_v17 = vmul.f32 %v725_v16, %v471_v15  ;;  %vm479_vm1 = vweird.f32 %v725_v16  ;;  %v727_v38 = vpop.eup %726 }
 0x182   : > { %vm480_vm3 = vmor %vm478_vm2, %vm479_vm1  ;;  %v530_v39 = vmul.f32 32.0, %v727_v38  ;;  %vm534_vm7 = vweird.f32 %v727_v38 }
 0x183   : > { %v474_v18 = vmul.f32 %v725_v16, %v473_v17 }
 0x184   : > { %v531_v40 = vsub.f32 1.0, %v530_v39 }
 0x185   : > { %v475_v19 = vmul.f32 0.5, %v474_v18 }
 0x186   : > { %v532_v41 = vmul.f32 %v727_v38, %v531_v40 }
 0x187   : > { %v476_v20 = vsub.f32 1.5, %v475_v19 }
 0x188   : > { %v533_v42 = vadd.f32 %v727_v38, %v532_v41 }
 0x189   : > { %v477_v21 = vmul.f32 %v725_v16, %v476_v20 }
 0x18a   : > { %v535_v43 = vsel %vm534_vm7, %v727_v38, %v533_v42 }
 0x18b   : > { %v481_v22 = vsel %vm480_vm3, %v725_v16, %v477_v21 }
 0x18c   : > { %484 = vperm.xlu1 %716, %v481_v22  }
 0x1fe   : > { %v485_v26 = vpop.permute.xlu1 %484 }
 0x1ff   : > { %v487_v27 = vmul.f32 %v485_v26, %v465_v10 }
 0x201   : > { %v492_v29 = vmul.f32 %v719_v25, %v487_v27 }
 0x203   : > { %v497_v30 = vadd.f32 %v720_v28, %v492_v29 }
 0x205   : > { %v498_v31 = vpack.c.bf16 %v497_v30, %v497_v30 }
 0x207   : > { %702 = vmatmul.msk.bf16.vlgmr.msra.gmra.mxu0 %vm504_vm5, %v498_v31 }
 0x284   : > { %v521_v33 = vpop.f32.mrf.mxu0 }
 0x285   : > { %v522_v34 = vadd.f32 %v721_v32, %v521_v33 }
 0x287   : > { %v526_v35 = vsel %vm525_vm6, %v522_v34, 0.0 }
 0x288   : > { %527 = vadd.xlane.f32.xlu2 %v526_v35 }
 0x28c   : > { %v523_v36 = vpop.f32.mrf.mxu0 }
 0x2fb   : > { %v528_v44 = vpop.xlane.xlu2 %527 }
 0x2fc   : > { %v536_v45 = vmul.f32 %v535_v43, %v528_v44 }
 0x2fe   : > { %v537_v46 = vsub.f32 %v522_v34, %v536_v45 }
 0x300   : > { %v538_v47 = vmul.f32 %v537_v46, %v537_v46 }
 0x302   : > { %v539_v48 = vsel %vm525_vm6, %v538_v47, 0.0 }
 0x303   : > { %540 = vadd.xlane.f32.xlu2 %v539_v48 }
 0x376   : > { %v541_v49 = vpop.xlane.xlu2 %540 }
 0x377   : > { %v542_v50 = vmul.f32 %v541_v49, %v535_v43 }
 0x379   : > { %v543_v51 = vadd.f32 1e-05, %v542_v50 }
 0x37b   : > { %728 = vrsqrt.f32 %v543_v51  ;;  %vm550_vm9 = vweird.f32 %v543_v51 }
 0x381   : > { %v729_v52 = vpop.eup %728 }
 0x382   : > { %v545_v53 = vmul.f32 %v729_v52, %v543_v51  ;;  %vm551_vm8 = vweird.f32 %v729_v52 }
 0x383   : > { %vm552_vm10 = vmor %vm550_vm9, %vm551_vm8 }
 0x384   : > { %v546_v54 = vmul.f32 %v729_v52, %v545_v53 }
 0x386   : > { %v547_v55 = vmul.f32 0.5, %v546_v54 }
 0x388   : > { %v548_v56 = vsub.f32 1.5, %v547_v55 }
 0x38a   : > { %v549_v57 = vmul.f32 %v729_v52, %v548_v56 }
 0x38c   : > { %v553_v59 = vsel %vm552_vm10, %v729_v52, %v549_v57 }
 0x38d   : > { %v554_v61 = vmul.f32 %v553_v59, %v537_v46 }
 0x38f   : > { %v559_v62 = vmul.f32 %v722_v58, %v554_v61 }
 0x391   : > { %v564_v63 = vadd.f32 %v723_v60, %v559_v62 }
 0x393   : > { %565 = vst.msk [vmem:[%s442_s28] sm:$0x3] %vm525_vm6, %v564_v63 }
 0x394 PF: > { %s19_s30 = sadd.s32 1, %s736_s30  }
 0x395   : > { %p16_p4 = scmp.ge.s32.totalorder %s19_s30, 5  }
 0x397   :  { %18 = sbr.rel (!%p16_p4) target bundleno = 1 (0x1), region = 110 }

// kernel: vit_forward.5
= control target key start
LH: loop header
LB: loop body
LE: loop exit
PB: predicated region body
PF: predicated region fallthrough
CT: control target
= control target key end

     0   :  { %vm25_vm0 = vcmask 254976   ;;  %s219_s0 = inlined_call_operand.vmem [shape: f32[2,32], index: 0, kind: input, shape index: {}]   ;;  %s220_s1 = inlined_call_operand.vmem [shape: f32[1,32], index: 1, kind: input, shape index: {}]   ;;  %s221_s2 = inlined_call_operand.vmem [shape: f32[1,32], index: 2, kind: input, shape index: {}]   ;;  %s222_s3 = inlined_call_operand.vmem [shape: bf16[32,128], index: 3, kind: input, shape index: {}]   ;;  %s223_s4 = inlined_call_operand.vmem [shape: f32[1,128], index: 4, kind: input, shape index: {}]   ;;  %s224_s5 = inlined_call_operand.hbm [shape: f32[2,128], index: 5, kind: output, shape index: {}]  }
   0x1   :  { %v22_v0 = vld [vmem:[%s219_s0] sm:$0x3] }
   0x2   :  { %v26_v1 = vsel %vm25_vm0, %v22_v0, 0.0 }
   0x3   :  { %27 = vadd.xlane.f32.xlu0 %v26_v1 }
   0x4   :  { %10 = vsyncpa [#allocation3], 0  ;;  %v164_v2 = vmov 32.0   ;;  %v128_v14 = vld [vmem:[%s222_s3 + $0x8] sm:$0xff]  ;;  %v127_v15 = vld [vmem:[%s222_s3] sm:$0xff]  ;;  %vm84_vm5 = vcmask 261120  }
   0x5   :  { %134 = vrcp.f32 %v164_v2  ;;  %94 = vmatpush.bf16.msra.mxu0 %v128_v14  ;;  %v131_v25 = vld [vmem:[%s220_s1] ss:$0 sm:$0xff]  ;;  %s165_s28 = smov [#allocation2]   ;;  %s109_s1 = sshll.u32 %s224_s5, 4  ;;  %s110_s1 = int_to_ptr.hbm [resolvable:$true] %s109_s1 }
   0x6   :  { %v132_v28 = vld [vmem:[%s221_s2] ss:$0 sm:$0xff]  ;;  %s107_s29 = sshll.u32 %s165_s28, 4  ;;  %s108_s29 = int_to_ptr.vmem [resolvable:$true] %s107_s29 }
   0x7   :  { %v133_v32 = vld [vmem:[%s223_s4] ss:$0 sm:$0xff] }
   0x9   :  { %95 = vmatpush.bf16.msra.mxu0 %v127_v15 }
   0xb   :  { %v135_v3 = vpop.eup %134 }
   0xc   :  { %v30_v4 = vmul.f32 32.0, %v135_v3  ;;  %vm34_vm1 = vweird.f32 %v135_v3 }
   0xe   :  { %v31_v5 = vsub.f32 1.0, %v30_v4 }
  0x10   :  { %v32_v6 = vmul.f32 %v135_v3, %v31_v5 }
  0x12   :  { %v33_v7 = vadd.f32 %v135_v3, %v32_v6 }
  0x14   :  { %v35_v8 = vsel %vm34_vm1, %v135_v3, %v33_v7 }
  0x76   :  { %v28_v9 = vpop.xlane.xlu0 %27 }
  0x77   :  { %v36_v10 = vmul.f32 %v35_v8, %v28_v9 }
  0x79   :  { %v37_v11 = vsub.f32 %v22_v0, %v36_v10 }
  0x7b   :  { %v38_v12 = vmul.f32 %v37_v11, %v37_v11 }
  0x7d   :  { %v39_v13 = vsel %vm25_vm0, %v38_v12, 0.0 }
  0x7e   :  { %40 = vadd.xlane.f32.xlu0 %v39_v13 }
  0xf1   :  { %v41_v16 = vpop.xlane.xlu0 %40 }
  0xf2   :  { %v42_v17 = vmul.f32 %v41_v16, %v35_v8 }
  0xf4   :  { %v43_v18 = vadd.f32 1e-05, %v42_v17 }
  0xf6   :  { %136 = vrsqrt.f32 %v43_v18  ;;  %vm50_vm3 = vweird.f32 %v43_v18 }
  0xfc   :  { %v137_v19 = vpop.eup %136 }
  0xfd   :  { %v45_v20 = vmul.f32 %v137_v19, %v43_v18  ;;  %vm51_vm2 = vweird.f32 %v137_v19 }
  0xfe   :  { %vm52_vm4 = vmor %vm50_vm3, %vm51_vm2 }
  0xff   :  { %v46_v21 = vmul.f32 %v137_v19, %v45_v20 }
 0x101   :  { %v47_v22 = vmul.f32 0.5, %v46_v21 }
 0x103   :  { %v48_v23 = vsub.f32 1.5, %v47_v22 }
 0x105   :  { %v49_v24 = vmul.f32 %v137_v19, %v48_v23 }
 0x107   :  { %v53_v26 = vsel %vm52_vm4, %v137_v19, %v49_v24 }
 0x108   :  { %v54_v27 = vmul.f32 %v53_v26, %v37_v11 }
 0x10a   :  { %v58_v29 = vmul.f32 %v131_v25, %v54_v27 }
 0x10c   :  { %v62_v30 = vadd.f32 %v132_v28, %v58_v29 }
 0x10e   :  { %v63_v31 = vpack.c.bf16 %v62_v30, %v62_v30 }
 0x110   :  { %126 = vmatmul.msk.bf16.vlgmr.msra.gmra.mxu0 %vm84_vm5, %v63_v31 }
 0x18d   :  { %v97_v33 = vpop.f32.mrf.mxu0 }
 0x18e   :  { %v98_v34 = vadd.f32 %v133_v32, %v97_v33 }
 0x190   :  { %101 = vst [vmem:[#allocation2] sm:$0x3] %v98_v34 }
 0x191   :  { %112 = dma.vmem_to_hbm [thread:$0]  %s108_s29, 32, %s110_s1, [#allocation3]  }
 0x195   :  { %v99_v35 = vpop.f32.mrf.mxu0 }
 0x196   :  { %162 = dma.done.wait [#allocation3], 32  }
 0x197   :  { %163 = vsyncadd [#allocation3], 4294967264 }
 0x198   :  { %117 = vsyncpa [#allocation3], 1 }

// kernel: vit_forward.4
= control target key start
LH: loop header
LB: loop body
LE: loop exit
PB: predicated region body
PF: predicated region fallthrough
CT: control target
= control target key end

     0   :  { %s1629_s21 = smov 0   ;;  %s1631_s22 = smov 0   ;;  %s1861_s0 = inlined_call_operand.vmem [shape: f32[16,32], index: 0, kind: input, shape index: {}]   ;;  %s1862_s1 = inlined_call_operand.vmem [shape: f32[2,1,32], index: 1, kind: input, shape index: {}]   ;;  %s1863_s2 = inlined_call_operand.vmem [shape: f32[2,1,32], index: 2, kind: input, shape index: {}]   ;;  %s1864_s3 = inlined_call_operand.vmem [shape: bf16[2,32,96], index: 3, kind: input, shape index: {}]   ;;  %s1865_s4 = inlined_call_operand.vmem [shape: bf16[2,32,32], index: 4, kind: input, shape index: {}]   ;;  %s1866_s5 = inlined_call_operand.vmem [shape: f32[2,1,32], index: 5, kind: input, shape index: {}]   ;;  %s1867_s6 = inlined_call_operand.vmem [shape: f32[2,1,32], index: 6, kind: input, shape index: {}]   ;;  %s1868_s7 = inlined_call_operand.vmem [shape: f32[2,1,32], index: 7, kind: input, shape index: {}]   ;;  %s1869_s8 = inlined_call_operand.vmem [shape: bf16[2,32,64], index: 8, kind: input, shape index: {}]   ;;  %s1870_s9 = inlined_call_operand.vmem [shape: f32[2,1,64], index: 9, kind: input, shape index: {}]   ;;  %s1871_s10 = inlined_call_operand.vmem [shape: bf16[2,64,32], index: 10, kind: input, shape index: {}]   ;;  %s1872_s11 = inlined_call_operand.vmem [shape: f32[2,1,32], index: 11, kind: input, shape index: {}]   ;;  %s1873_s12 = inlined_call_operand.vmem [shape: f32[16,32], index: 12, kind: output, shape index: {}]  }
   0x1   :  { %1879 = sst [smem:[#allocation9_spill]] %s1861_s0  ;;  %s1633_s23 = smov 0  }
   0x2   :  { %1880 = sst [smem:[#allocation10_spill]] %s1864_s3  ;;  %s1635_s24 = smov 0  }
   0x3   :  { %1881 = sst [smem:[#allocation11_spill]] %s1865_s4  ;;  %s1637_s25 = smov 0  }
   0x4 LB: > { %1882 = sst [smem:[#allocation2_spill]] %s1530_s21  ;;  %s31_s26 = sadd.s32 1, %s1538_s23  ;;  %s1546_s25 = sphi %s1637_s25, %s22_s25   ;;  %s1542_s24 = sphi %s1635_s24, %s1902_s24   ;;  %s1538_s23 = sphi %s1633_s23, %s1901_s23   ;;  %s1534_s22 = sphi %s1631_s22, %s1900_s22   ;;  %s1530_s21 = sphi %s1629_s21, %s1899_s21  }
   0x5   : > { %1883 = sst [smem:[#allocation3_spill]] %s1538_s23  ;;  %s34_s27 = sadd.s32 1, %s1542_s24 }
   0x6   : > { %1884 = sst [smem:[#allocation4_spill]] %s1542_s24  ;;  %p32_p0 = scmp.ge.s32.totalorder %s31_s26, 2 }
   0x7   : > { %1885 = sst [smem:[#allocation5_spill]] %s1546_s25  ;;  %p1341_p1 = scmp.ge.s32.totalorder %s1546_s25, 1 }
   0x8   : > { %p469_p2 = scmp.lt.s32.totalorder %s1546_s25, 5  ;;  %s1904_s26 = smov (%p32_p0, %s31_s26), 0 }
   0x9   : > { %1886 = sst [smem:[#allocation6_spill]] %s1904_s26  ;;  %s1906_s27 = smov (!%p32_p0, %s34_s27), %s1542_s24 }
   0xa   : > { %p470_p3 = pnand %p1341_p1, %p469_p2  ;;  %p36_p4 = scmp.ge.s32.totalorder %s1906_s27, 2 }
   0xc   : > { %s1908_s27 = smov (%p36_p4, %s1906_s27), 0  ;;  %473 = sbr.rel (%p470_p3) target bundleno = 1933 (0x78d), region = 68 }
   0xd   : > { %1887 = sst [smem:[#allocation7_spill]] %s1908_s27 }
  0x11   : > { %p550_p5 = scmp.lt.s32.totalorder %s1534_s22, 1  ;;  %p554_p6 = scmp.lt.s32.totalorder %s1530_s21, 1 }
  0x12   : > { %s1888_s0 = sld [smem:[#allocation9_spill]] }
  0x13   : > { %s1910_s22 = smov (!%p550_p5, %s1534_s22), 1  ;;  %s1889_s3 = sld [smem:[#allocation10_spill]] }
  0x14   : > { %s1663_s28 = scalar_select %p554_p6, %s1530_s21, 1 }
  0x15   : > { %s1342_s29 = sshll.u32 %s1910_s22, 3  ;;  %s1890_s4 = sld [smem:[#allocation11_spill]] }
  0x16   : > { %s1407_s27 = sshll.u32 %s1663_s28, 4  ;;  %s575_s18 = scalar_lea.vmem %s1867_s6, %s1663_s28 }
  0x17   : > { %s594_s20 = scalar_lea.vmem %s1872_s11, %s1663_s28  ;;  %s1721_s24 = scalar_lea.vmem %s1873_s12, %s1342_s29 }
  0x18   : > { %s553_s14 = scalar_lea.vmem %s1888_s0, %s1342_s29 }
  0x19   : > { %s1680_s23 = scalar_lea.vmem %s1889_s3, %s1407_s27  ;;  %s1702_s3 = scalar_lea.vmem %s1869_s8, %s1407_s27 }
  0x1b   : > { %s1685_s21 = scalar_lea.vmem %s1890_s4, %s1407_s27  ;;  %s586_s4 = scalar_lea.vmem %s1870_s9, %s1663_s28 }
  0x1c   : > { %1891 = sst [smem:[#allocation8_spill]] %s1685_s21  ;;  %s1410_s21 = sshll.u32 %s1663_s28, 5 }
  0x1d   : > { %s1712_s15 = scalar_lea.vmem %s1871_s10, %s1410_s21  ;;  %s1892_s27 = sld [smem:[#allocation2_spill]] }
  0x23   : > { %p1352_p7 = scmp.ne.s32.totalorder %s1892_s27, 0 }
  0x25   : > { %603 = sbr.rel (%p1352_p7) target bundleno = 44 (0x2c), region = 72 }
  0x2a   : > { %v604_v0 = vld [vmem:[%s553_s14] sm:$0xff]  ;;  %vm605_vm0 = vcmask 261120  }
  0x2b   : > { %606 = vst.msk [vmem:[%s1721_s24] sm:$0xff] %vm605_vm0, %v604_v0 }
  0x2c PF: > { %vm614_vm1 = vcmask 261120   ;;  %v1548_v3 = vmov 32.0   ;;  %v1412_v15 = vld [vmem:[%s1680_s23 + $0x8] sm:$0xff]  ;;  %v1411_v16 = vld [vmem:[%s1680_s23] sm:$0xff]  ;;  %s1893_s23 = scalar_lea.vmem %s1862_s1, %s1663_s28  ;;  %s1894_s26 = scalar_lea.vmem %s1863_s2, %s1663_s28  ;;  %vm691_vm6 = vcmask 64512   ;;  %v608_v49 = vlaneseq }
  0x2d   : > { %1484 = vrcp.f32 %v1548_v3  ;;  %678 = vmatpush.bf16.msra.mxu0 %v1412_v15  ;;  %v1477_v26 = vld [vmem:[%s1893_s23] ss:$0 sm:$0xff]  ;;  %s1549_s25 = smov 104   ;;  %s1550_s22 = smov 120   ;;  %v1556_v52 = vmov -1e+30  }
  0x2e   : > { %v1478_v29 = vld [vmem:[%s1894_s26] ss:$0 sm:$0xff]  ;;  %s1551_s30 = smov 96   ;;  %s1552_s13 = smov 72   ;;  %v609_v50 = vand.u32 127, %v608_v49  ;;  %vm743_vm12 = vcmask 1043456  }
  0x2f   : > { %s1553_s17 = smov 88   ;;  %s1554_s16 = smov 112  }
  0x30   : > { %s1555_s19 = smov 80   ;;  %vm610_vm7 = vcmp.lt.s32.totalorder %v609_v50, 4  ;;  %s1557_s27 = smov 64  }
  0x31   : > { %679 = vmatpush.bf16.msra.mxu0 %v1411_v16  ;;  %v611_v53 = vsel %vm610_vm7, 0.0, %v1556_v52  ;;  %s1558_s0 = smov 48   ;;  %s1559_s21 = smov 56  }
  0x32   : > { %v1726_v1 = vld [vmem:[%s1721_s24] sm:$0xff]  ;;  %s1560_s23 = smov 40   ;;  %s1895_s29 = sld [smem:[#allocation8_spill]] }
  0x33   : > { %v615_v2 = vsel %vm614_vm1, %v1726_v1, 0.0  ;;  %v1485_v4 = vpop.eup %1484  ;;  %s1561_s14 = smov 16   ;;  %s1562_s26 = smov 8  }
  0x34   : > { %616 = vadd.xlane.f32.xlu0 %v615_v2  ;;  %v619_v5 = vmul.f32 32.0, %v1485_v4  ;;  %vm623_vm2 = vweird.f32 %v1485_v4 }
  0x36   : > { %v620_v6 = vsub.f32 1.0, %v619_v5 }
  0x38   : > { %v621_v7 = vmul.f32 %v1485_v4, %v620_v6 }
  0x3a   : > { %v622_v8 = vadd.f32 %v1485_v4, %v621_v7 }
  0x3c   : > { %v1730_v9 = vsel %vm623_vm2, %v1485_v4, %v622_v8 }
  0xa7   : > { %v617_v10 = vpop.xlane.xlu0 %616 }
  0xa8   : > { %v625_v11 = vmul.f32 %v1730_v9, %v617_v10 }
  0xaa   : > { %v626_v12 = vsub.f32 %v1726_v1, %v625_v11 }
  0xac   : > { %v627_v13 = vmul.f32 %v626_v12, %v626_v12 }
  0xae   : > { %v628_v14 = vsel %vm614_vm1, %v627_v13, 0.0 }
  0xaf   : > { %629 = vadd.xlane.f32.xlu0 %v628_v14 }
 0x122   : > { %v630_v17 = vpop.xlane.xlu0 %629 }
 0x123   : > { %v631_v18 = vmul.f32 %v630_v17, %v1730_v9 }
 0x125   : > { %v632_v19 = vadd.f32 1e-05, %v631_v18 }
 0x127   : > { %1486 = vrsqrt.f32 %v632_v19  ;;  %vm639_vm4 = vweird.f32 %v632_v19 }
 0x12d   : > { %v1487_v20 = vpop.eup %1486 }
 0x12e   : > { %v634_v21 = vmul.f32 %v1487_v20, %v632_v19  ;;  %vm640_vm3 = vweird.f32 %v1487_v20 }
 0x12f   : > { %vm641_vm5 = vmor %vm639_vm4, %vm640_vm3 }
 0x130   : > { %v635_v22 = vmul.f32 %v1487_v20, %v634_v21 }
 0x132   : > { %v636_v23 = vmul.f32 0.5, %v635_v22 }
 0x134   : > { %v637_v24 = vsub.f32 1.5, %v636_v23 }
 0x136   : > { %v638_v25 = vmul.f32 %v1487_v20, %v637_v24 }
 0x138   : > { %v642_v27 = vsel %vm641_vm5, %v1487_v20, %v638_v25 }
 0x139   : > { %v643_v28 = vmul.f32 %v642_v27, %v626_v12 }
 0x13b   : > { %v647_v30 = vmul.f32 %v1477_v26, %v643_v28 }
 0x13d   : > { %v651_v31 = vadd.f32 %v1478_v29, %v647_v30 }
 0x13f   : > { %v652_v32 = vpack.c.bf16 %v651_v31, %v651_v31 }
 0x141   : > { %1361 = vmatmul.msk.bf16.vlgmr.msra.gmra.mxu0 %vm614_vm1, %v652_v32 }
 0x1be   : > { %v681_v33 = vpop.f32.mrf.mxu0 }
 0x1bf   : > { %v685_v34 = vpack.c.bf16 %v681_v33, %v681_v33 }
 0x1c1   : > { %v687_v35 = vunpack.c.l.b16 %v685_v34 }
 0x1c3   : > { %v1749_v36 = vpack.c.b16 %v687_v35, %v687_v35 }
 0x1c5   : > { %902 = vrot.lane.b32.xlu0 %v1749_v36, %s1549_s25  ;;  %760 = vrot.lane.b32.xlu2 %v1749_v36, %s1550_s22  ;;  %s1563_s25 = smov 24  }
 0x1c6   : > { %689 = vrot.lane.b32.xlu1 %v1749_v36, %s1551_s30  ;;  %v683_v37 = vpop.f32.mrf.mxu0 }
 0x1cd   : > { %904 = vrot.lane.b32.xlu2 %v1749_v36, %s1552_s13  ;;  %s1896_s13 = scalar_lea.vmem %s1866_s5, %s1663_s28 }
 0x1ce   : > { %762 = vrot.lane.b32.xlu1 %v1749_v36, %s1553_s17 }
 0x1d5   : > { %831 = vrot.lane.b32.xlu2 %v1749_v36, %s1554_s16 }
 0x1d6   : > { %833 = vrot.lane.b32.xlu1 %v1749_v36, %s1555_s19 }
 0x21f   : > { %v761_v38 = vpop.permute.xlu2 %760 }
 0x227   : > { %v905_v41 = vpop.permute.xlu2 %904 }
 0x228   : > { %v910_v44 = vsel %vm691_vm6, %v905_v41, 0 }
 0x22f   : > { %v832_v47 = vpop.permute.xlu2 %831 }
 0x237   : > { %v903_v48 = vpop.permute.xlu0 %902 }
 0x238   : > { %v690_v39 = vpop.permute.xlu1 %689 }
 0x239   : > { %v696_v40 = vsel %vm691_vm6, %v690_v39, 0 }
 0x23a   : > { %705 = vmatpush.bf16.xpose.msra.mxu1 %v696_v40 }
 0x240   : > { %v763_v42 = vpop.permute.xlu1 %762 }
 0x241   : > { %1362 = vmatmul.msk.bf16.vlgmr.msra.gmra.mxu1 %vm691_vm6, %v685_v34  ;;  %v768_v43 = vsel %vm691_vm6, %v763_v42, 0 }
 0x242   : > { %777 = vmatpush.bf16.xpose.msra.mxu3 %v768_v43 }
 0x248   : > { %v834_v45 = vpop.permute.xlu1 %833 }
 0x249   : > { %1364 = vmatmul.msk.bf16.vlgmr.msra.gmra.mxu3 %vm691_vm6, %v761_v38  ;;  %v839_v46 = vsel %vm691_vm6, %v834_v45, 0 }
 0x24a   : > { %919 = vmatpush.bf16.xpose.msrb.mxu3 %v910_v44  ;;  %848 = vmatpush.bf16.xpose.msrb.mxu0 %v839_v46 }
 0x251   : > { %1366 = vmatmul.msk.bf16.vlgmr.msrb.gmra.mxu0 %vm691_vm6, %v832_v47 }
 0x259   : > { %1368 = vmatmul.msk.bf16.vlgmr.msrb.gmra.mxu3 %vm691_vm6, %v903_v48 }
 0x2be   : > { %v707_v51 = vpop.f32.mrf.mxu1 }
 0x2bf   : > { %v711_v54 = vmul.f32 0.35355338, %v707_v51 }
 0x2c1   : > { %v712_v55 = vadd.f32 %v711_v54, %v611_v53 }
 0x2c3   : > { %v713_v56 = vsel %vm691_vm6, %v712_v55, -inf }
 0x2c4   : > { %714 = vmax.xlane.f32.xlu1 %v713_v56 }
 0x2c6   : > { %v709_v57 = vpop.f32.mrf.mxu1 }
 0x2cc   : > { %v779_v58 = vpop.f32.mrf.mxu3 }
 0x2cd   : > { %v783_v59 = vmul.f32 0.35355338, %v779_v58 }
 0x2ce   : > { %v850_v60 = vpop.f32.mrf.mxu0 }
 0x2cf   : > { %v784_v61 = vadd.f32 %v783_v59, %v611_v53  ;;  %v854_v62 = vmul.f32 0.35355338, %v850_v60 }
 0x2d1   : > { %v785_v63 = vsel %vm691_vm6, %v784_v61, -inf  ;;  %v855_v2 = vadd.f32 %v854_v62, %v611_v53 }
 0x2d2   : > { %786 = vmax.xlane.f32.xlu2 %v785_v63 }
 0x2d3   : > { %v856_v4 = vsel %vm691_vm6, %v855_v2, -inf }
 0x2d4   : > { %v781_v0 = vpop.f32.mrf.mxu3 }
 0x2d6   : > { %v852_v3 = vpop.f32.mrf.mxu0 }
 0x2da   : > { %857 = vmax.xlane.f32.xlu2 %v856_v4 }
 0x2dc   : > { %v921_v5 = vpop.f32.mrf.mxu3 }
 0x2dd   : > { %v925_v6 = vmul.f32 0.35355338, %v921_v5 }
 0x2df   : > { %v926_v7 = vadd.f32 %v925_v6, %v611_v53 }
 0x2e1   : > { %v927_v8 = vsel %vm691_vm6, %v926_v7, -inf }
 0x2e2   : > { %928 = vmax.xlane.f32.xlu0 %v927_v8 }
 0x2e4   : > { %v923_v10 = vpop.f32.mrf.mxu3 }
 0x337   : > { %v715_v11 = vpop.xlane.xlu1 %714 }
 0x338   : > { %v716_v12 = vsub.f32 %v712_v55, %v715_v11 }
 0x33a   : > { %v717_v13 = vmul.f32 1.442695, %v716_v12 }
 0x33c   : > { %1488 = vpow2.f32 %v717_v13 }
 0x342   : > { %v1489_v14 = vpop.eup %1488 }
 0x343   : > { %v719_v15 = vsel %vm691_vm6, %v1489_v14, 0.0 }
 0x344   : > { %720 = vadd.xlane.f32.xlu1 %v719_v15 }
 0x345   : > { %v787_v16 = vpop.xlane.xlu2 %786 }
 0x346   : > { %v788_v17 = vsub.f32 %v784_v61, %v787_v16 }
 0x348   : > { %v789_v18 = vmul.f32 1.442695, %v788_v17 }
 0x34a   : > { %1490 = vpow2.f32 %v789_v18 }
 0x34d   : > { %v858_v19 = vpop.xlane.xlu2 %857 }
 0x34e   : > { %v859_v20 = vsub.f32 %v855_v2, %v858_v19 }
 0x350   : > { %v1771_v21 = vpop.eup %1490  ;;  %v860_v22 = vmul.f32 1.442695, %v859_v20 }
 0x351   : > { %v791_v23 = vsel %vm691_vm6, %v1771_v21, 0.0 }
 0x352   : > { %1492 = vpow2.f32 %v860_v22  ;;  %792 = vadd.xlane.f32.xlu2 %v791_v23 }
 0x355   : > { %v929_v24 = vpop.xlane.xlu0 %928 }
 0x356   : > { %v930_v25 = vsub.f32 %v926_v7, %v929_v24 }
 0x358   : > { %v1775_v26 = vpop.eup %1492  ;;  %v931_v27 = vmul.f32 1.442695, %v930_v25 }
 0x359   : > { %v862_v28 = vsel %vm691_vm6, %v1775_v26, 0.0 }
 0x35a   : > { %1494 = vpow2.f32 %v931_v27  ;;  %863 = vadd.xlane.f32.xlu0 %v862_v28 }
 0x35d   : > { %738 = vrot.lane.b32.xlu1 %v1749_v36, %s1557_s27  ;;  %s1897_s27 = scalar_lea.vmem %s1868_s7, %s1663_s28 }
 0x360   : > { %v1780_v29 = vpop.eup %1494 }
 0x361   : > { %v933_v30 = vsel %vm691_vm6, %v1780_v29, 0.0 }
 0x362   : > { %934 = vadd.xlane.f32.xlu0 %v933_v30 }
 0x365   : > { %881 = vrot.lane.b32.xlu1 %v1749_v36, %s1558_s0 }
 0x36a   : > { %810 = vrot.lane.b32.xlu2 %v1749_v36, %s1559_s21 }
 0x376   : > { %952 = vrot.lane.b32.xlu0 %v1749_v36, %s1560_s23 }
 0x3b7   : > { %v721_v31 = vpop.xlane.xlu1 %720 }
 0x3b8   : > { %1496 = vrcp.f32 %v721_v31  ;;  %v733_v37 = vand.u32 2147483648, %v721_v31  ;;  %vm727_vm9 = vweird.f32 %v721_v31  ;;  %v731_v40 = vand.u32 2147483647, %v721_v31 }
 0x3ba   : > { %v734_v42 = vor.u32 1.1754944e-38, %v733_v37  ;;  %vm732_vm11 = vcmp.eq.f32.partialorder %v731_v40, 8.507059e+37 }
 0x3be   : > { %v1497_v32 = vpop.eup %1496 }
 0x3bf   : > { %v723_v33 = vmul.f32 %v1497_v32, %v721_v31  ;;  %vm728_vm8 = vweird.f32 %v1497_v32 }
 0x3c0   : > { %vm729_vm10 = vmor %vm727_vm9, %vm728_vm8 }
 0x3c1   : > { %v724_v34 = vsub.f32 1.0, %v723_v33 }
 0x3c3   : > { %v725_v35 = vmul.f32 %v1497_v32, %v724_v34 }
 0x3c5   : > { %v793_v38 = vpop.xlane.xlu2 %792  ;;  %v726_v39 = vadd.f32 %v1497_v32, %v725_v35 }
 0x3c6   : > { %1498 = vrcp.f32 %v793_v38  ;;  %v805_v56 = vand.u32 2147483648, %v793_v38  ;;  %vm799_vm14 = vweird.f32 %v793_v38  ;;  %v803_v59 = vand.u32 2147483647, %v793_v38 }
 0x3c7   : > { %v730_v41 = vsel %vm729_vm10, %v1497_v32, %v726_v39  ;;  %v1413_v39 = vld [vmem:[%s1895_s29] sm:$0xff] }
 0x3c8   : > { %v735_v43 = vsel %vm732_vm11, %v734_v42, %v730_v41  ;;  %v806_v2 = vor.u32 1.1754944e-38, %v805_v56  ;;  %vm804_vm2 = vcmp.eq.f32.partialorder %v803_v59, 8.507059e+37  ;;  %vm986_vm11 = vcmask 130048  }
 0x3c9   : > { %v736_v47 = vmul.f32 %v1489_v14, %v735_v43 }
 0x3cb   : > { %v737_v53 = vpack.c.bf16 %v736_v47, %v736_v47 }
 0x3cc   : > { %v1499_v44 = vpop.eup %1498 }
 0x3cd   : > { %v795_v36 = vmul.f32 %v1499_v44, %v793_v38  ;;  %v864_v45 = vpop.xlane.xlu0 %863  ;;  %v811_v46 = vpop.permute.xlu2 %810  ;;  %vm800_vm13 = vweird.f32 %v1499_v44  ;;  %v1414_v38 = vld [vmem:[%s1895_s29 + $0x8] sm:$0xff] }
 0x3ce   : > { %1500 = vrcp.f32 %v864_v45  ;;  %v816_v52 = vsel %vm743_vm12, %v811_v46, 0  ;;  %vm801_vm15 = vmor %vm799_vm14, %vm800_vm13  ;;  %v876_v62 = vand.u32 2147483648, %v864_v45  ;;  %v874_v4 = vand.u32 2147483647, %v864_v45  ;;  %1020 = vmatpush.bf16.msra.mxu0 %v1414_v38  ;;  %v1479_v46 = vld [vmem:[%s1896_s13] ss:$0 sm:$0xff] }
 0x3cf   : > { %v796_v48 = vsub.f32 1.0, %v795_v36  ;;  %v739_v49 = vpop.permute.xlu1 %738  ;;  %vm870_vm3 = vweird.f32 %v864_v45 }
 0x3d0   : > { %v745_v50 = vsel %vm743_vm12, %v739_v49, 0  ;;  %v877_v8 = vor.u32 1.1754944e-38, %v876_v62  ;;  %vm875_vm5 = vcmp.eq.f32.partialorder %v874_v4, 8.507059e+37  ;;  %v1480_v4 = vld [vmem:[%s575_s18] ss:$0 sm:$0xff] }
 0x3d1   : > { %v797_v51 = vmul.f32 %v1499_v44, %v796_v48  ;;  %754 = vmatpush.bf16.msra.mxu2 %v745_v50 }
 0x3d2   : > { %1021 = vmatpush.bf16.msra.mxu0 %v1413_v39 }
 0x3d3   : > { %v798_v55 = vadd.f32 %v1499_v44, %v797_v51 }
 0x3d4   : > { %v1501_v54 = vpop.eup %1500  ;;  %1363 = vmatmul.msk.bf16.vlgmr.msra.gmra.mxu2 %vm691_vm6, %v737_v53 }
 0x3d5   : > { %825 = vmatpush.bf16.msrb.mxu2 %v816_v52  ;;  %v866_v57 = vmul.f32 %v1501_v54, %v864_v45  ;;  %v935_v58 = vpop.xlane.xlu0 %934  ;;  %v802_v0 = vsel %vm801_vm15, %v1499_v44, %v798_v55  ;;  %vm871_vm0 = vweird.f32 %v1501_v54  ;;  %vm1143_vm15 = vcmask 523264  }
 0x3d6   : > { %1502 = vrcp.f32 %v935_v58  ;;  %v807_v6 = vsel %vm804_vm2, %v806_v2, %v802_v0  ;;  %vm872_vm4 = vmor %vm870_vm3, %vm871_vm0  ;;  %v947_v20 = vand.u32 2147483648, %v935_v58  ;;  %vm941_vm8 = vweird.f32 %v935_v58 }
 0x3d7   : > { %v867_v60 = vsub.f32 1.0, %v866_v57  ;;  %v882_v61 = vpop.permute.xlu1 %881  ;;  %v808_v13 = vmul.f32 %v1771_v21, %v807_v6  ;;  %v945_v22 = vand.u32 2147483647, %v935_v58  ;;  %v1416_v57 = vld [vmem:[%s1702_s3 + $0x8] sm:$0xff]  ;;  %v1481_v6 = vld [vmem:[%s1897_s27] ss:$0 sm:$0xff] }
 0x3d8   : > { %v887_v63 = vsel %vm743_vm12, %v882_v61, 0  ;;  %v948_v25 = vor.u32 1.1754944e-38, %v947_v20 }
 0x3d9   : > { %v868_v3 = vmul.f32 %v1501_v54, %v867_v60  ;;  %896 = vmatpush.bf16.msrb.mxu1 %v887_v63  ;;  %v809_v18 = vpack.c.bf16 %v808_v13, %v808_v13  ;;  %vm946_vm10 = vcmp.eq.f32.partialorder %v945_v22, 8.507059e+37  ;;  %v1418_v13 = vld [vmem:[%s1712_s15 + $0x8] sm:$0xff] }
 0x3db   : > { %v869_v5 = vadd.f32 %v1501_v54, %v868_v3 }
 0x3dc   : > { %v1503_v7 = vpop.eup %1502 }
 0x3dd   : > { %v937_v10 = vmul.f32 %v1503_v7, %v935_v58  ;;  %v873_v11 = vsel %vm872_vm4, %v1501_v54, %v869_v5  ;;  %vm942_vm7 = vweird.f32 %v1503_v7  ;;  %1090 = vmatpush.bf16.msra.mxu1 %v1416_v57  ;;  %v1415_v58 = vld [vmem:[%s1702_s3] sm:$0xff] }
 0x3de   : > { %v878_v12 = vsel %vm875_vm5, %v877_v8, %v873_v11  ;;  %vm943_vm9 = vmor %vm941_vm8, %vm942_vm7  ;;  %v1420_v11 = vld [vmem:[%s1712_s15 + $0x18] sm:$0xff] }
 0x3df   : > { %v938_v14 = vsub.f32 1.0, %v937_v10  ;;  %v879_v15 = vmul.f32 %v1775_v26, %v878_v12  ;;  %1151 = vmatpush.bf16.msra.mxu3 %v1420_v11  ;;  %v1419_v12 = vld [vmem:[%s1712_s15 + $0x10] sm:$0xff] }
 0x3e1   : > { %v939_v16 = vmul.f32 %v1503_v7, %v938_v14  ;;  %v880_v17 = vpack.c.bf16 %v879_v15, %v879_v15  ;;  %1091 = vmatpush.bf16.msra.mxu1 %v1415_v58  ;;  %v1417_v14 = vld [vmem:[%s1712_s15] sm:$0xff] }
 0x3e2   : > { %v1482_v15 = vld [vmem:[%s586_s4] ss:$0 sm:$0xff] }
 0x3e3   : > { %1367 = vmatmul.msk.bf16.vlgmr.msrb.gmra.mxu1 %vm691_vm6, %v880_v17  ;;  %v940_v19 = vadd.f32 %v1503_v7, %v939_v16  ;;  %1152 = vmatpush.bf16.msra.mxu3 %v1419_v12 }
 0x3e4   : > { %1365 = vmatmul.msk.bf16.vlgmr.msrb.gmra.mxu2 %vm691_vm6, %v809_v18 }
 0x3e5   : > { %v944_v23 = vsel %vm943_vm9, %v1503_v7, %v940_v19 }
 0x3e6   : > { %v949_v26 = vsel %vm946_vm10, %v948_v25, %v944_v23 }
 0x3e7   : > { %v950_v27 = vmul.f32 %v1780_v29, %v949_v26  ;;  %1153 = vmatpush.bf16.msra.mxu3 %v1418_v13 }
 0x3e8   : > { %v953_v24 = vpop.permute.xlu0 %952 }
 0x3e9   : > { %v958_v21 = vsel %vm743_vm12, %v953_v24, 0  ;;  %v951_v28 = vpack.c.bf16 %v950_v27, %v950_v27  ;;  %vm988_vm12 = vcmask 195584  }
 0x3ea   : > { %967 = vmatpush.bf16.msra.mxu2 %v958_v21 }
 0x3eb   : > { %1154 = vmatpush.bf16.msra.mxu3 %v1417_v14 }
 0x3f4   : > { %1369 = vmatmul.msk.bf16.vlgmr.msra.gmra.mxu2 %vm691_vm6, %v951_v28 }
 0x457   : > { %v756_v30 = vpop.f32.mrf.mxu2 }
 0x45f   : > { %v758_v31 = vpop.f32.mrf.mxu2 }
 0x460   : > { %v898_v32 = vpop.f32.mrf.mxu1 }
 0x461   : > { %978 = vrot.lane.b32.xlu1 %v898_v32, %s1561_s14 }
 0x467   : > { %v827_v33 = vpop.f32.mrf.mxu2 }
 0x468   : > { %v900_v34 = vpop.f32.mrf.mxu1  ;;  %974 = vrot.lane.b32.xlu2 %v827_v33, %s1562_s26 }
 0x46f   : > { %v829_v35 = vpop.f32.mrf.mxu2 }
 0x477   : > { %v969_v37 = vpop.f32.mrf.mxu2 }
 0x478   : > { %982 = vrot.lane.b32.xlu2 %v969_v37, %s1563_s25 }
 0x47f   : > { %v971_v29 = vpop.f32.mrf.mxu2 }
 0x4c2   : > { %v975_v40 = vpop.permute.xlu2 %974 }
 0x4c3   : > { %v985_v41 = vsel %vm691_vm6, %v756_v30, %v975_v40  ;;  %v1483_v30 = vld [vmem:[%s594_s20] ss:$0 sm:$0xff] }
 0x4d2   : > { %v983_v43 = vpop.permute.xlu2 %982 }
 0x4d3   : > { %v979_v42 = vpop.permute.xlu1 %978 }
 0x4d4   : > { %v987_v44 = vsel %vm986_vm11, %v985_v41, %v979_v42 }
 0x4d5   : > { %v989_v36 = vsel %vm988_vm12, %v987_v44, %v983_v43 }
 0x4d6   : > { %v990_v45 = vpack.c.bf16 %v989_v36, %v989_v36 }
 0x4d8   : > { %1378 = vmatmul.msk.bf16.vlgmr.msra.gmra.mxu0 %vm614_vm1, %v990_v45 }
 0x555   : > { %v1023_v47 = vpop.f32.mrf.mxu0 }
 0x556   : > { %v1024_v48 = vadd.f32 %v1479_v46, %v1023_v47 }
 0x558   : > { %v1808_v49 = vadd.f32 %v1024_v48, %v1726_v1 }
 0x55a   : > { %v1030_v50 = vsel %vm614_vm1, %v1808_v49, 0.0 }
 0x55b   : > { %1031 = vadd.xlane.f32.xlu0 %v1030_v50 }
 0x55d   : > { %v1025_v51 = vpop.f32.mrf.mxu0 }
 0x5ce   : > { %v1032_v52 = vpop.xlane.xlu0 %1031 }
 0x5cf   : > { %v1033_v53 = vmul.f32 %v1032_v52, %v1730_v9 }
 0x5d1   : > { %v1034_v54 = vsub.f32 %v1808_v49, %v1033_v53 }
 0x5d3   : > { %v1035_v55 = vmul.f32 %v1034_v54, %v1034_v54 }
 0x5d5   : > { %v1036_v56 = vsel %vm614_vm1, %v1035_v55, 0.0 }
 0x5d6   : > { %1037 = vadd.xlane.f32.xlu1 %v1036_v56 }
 0x649   : > { %v1038_v1 = vpop.xlane.xlu1 %1037 }
 0x64a   : > { %v1039_v59 = vmul.f32 %v1038_v1, %v1730_v9 }
 0x64c   : > { %v1040_v60 = vadd.f32 1e-05, %v1039_v59 }
 0x64e   : > { %1504 = vrsqrt.f32 %v1040_v60  ;;  %vm1047_vm13 = vweird.f32 %v1040_v60 }
 0x654   : > { %v1505_v61 = vpop.eup %1504 }
 0x655   : > { %v1042_v62 = vmul.f32 %v1505_v61, %v1040_v60  ;;  %vm1048_vm6 = vweird.f32 %v1505_v61 }
 0x656   : > { %vm1049_vm14 = vmor %vm1047_vm13, %vm1048_vm6 }
 0x657   : > { %v1043_v63 = vmul.f32 %v1505_v61, %v1042_v62 }
 0x659   : > { %v1044_v0 = vmul.f32 0.5, %v1043_v63 }
 0x65b   : > { %v1045_v2 = vsub.f32 1.5, %v1044_v0 }
 0x65d   : > { %v1046_v3 = vmul.f32 %v1505_v61, %v1045_v2 }
 0x65f   : > { %v1050_v9 = vsel %vm1049_vm14, %v1505_v61, %v1046_v3 }
 0x660   : > { %v1051_v5 = vmul.f32 %v1050_v9, %v1034_v54 }
 0x662   : > { %v1055_v7 = vmul.f32 %v1480_v4, %v1051_v5 }
 0x664   : > { %v1059_v8 = vadd.f32 %v1481_v6, %v1055_v7 }
 0x666   : > { %v1060_v10 = vpack.c.bf16 %v1059_v8, %v1059_v8 }
 0x668   : > { %1387 = vmatmul.msk.bf16.vlgmr.msra.gmra.mxu1 %vm614_vm1, %v1060_v10 }
 0x6e5   : > { %v1093_v16 = vpop.f32.mrf.mxu1 }
 0x6e6   : > { %v1094_v17 = vadd.f32 %v1482_v15, %v1093_v16 }
 0x6e8   : > { %v1097_v18 = vmul.f32 %v1094_v17, %v1094_v17 }
 0x6ea   : > { %v1098_v19 = vmul.f32 %v1097_v18, %v1094_v17 }
 0x6ec   : > { %v1099_v20 = vmul.f32 0.044715, %v1098_v19 }
 0x6ed   : > { %v1095_v22 = vpop.f32.mrf.mxu1 }
 0x6ee   : > { %v1100_v23 = vadd.f32 %v1099_v20, %v1094_v17 }
 0x6f0   : > { %v1101_v24 = vmul.f32 0.7978846, %v1100_v23 }
 0x6f2   : > { %1506 = vtanh.f32 %v1101_v24 }
 0x6f8   : > { %v1507_v25 = vpop.eup %1506 }
 0x6f9   : > { %v1103_v21 = vadd.f32 1.0, %v1507_v25 }
 0x6fb   : > { %v1104_v26 = vmul.f32 0.5, %v1103_v21 }
 0x6fd   : > { %v1105_v27 = vmul.f32 %v1104_v26, %v1094_v17 }
 0x6ff   : > { %v1106_v28 = vpack.c.bf16 %v1105_v27, %v1105_v27 }
 0x701   : > { %1404 = vmatmul.msk.bf16.vlgmr.msra.gmra.mxu3 %vm1143_vm15, %v1106_v28 }
 0x784   : > { %v1156_v31 = vpop.f32.mrf.mxu3 }
 0x785   : > { %v1157_v32 = vadd.f32 %v1483_v30, %v1156_v31 }
 0x787   : > { %v1160_v33 = vadd.f32 %v1157_v32, %v1808_v49 }
 0x789   : > { %1161 = vst.msk [vmem:[%s1721_s24] sm:$0xff] %vm614_vm1, %v1160_v33 }
 0x78c   : > { %v1158_v34 = vpop.f32.mrf.mxu3 }
 0x78d PF: > { %s1898_s21 = sld [smem:[#allocation5_spill]] }
 0x78e   : > { %s1900_s22 = sld [smem:[#allocation4_spill]] }
 0x78f   : > { %s1901_s23 = sld [smem:[#allocation6_spill]] }
 0x790   : > { %s1902_s24 = sld [smem:[#allocation7_spill]] }
 0x793   : > { %s22_s25 = sadd.s32 1, %s1898_s21   ;;  %s1899_s21 = sld [smem:[#allocation3_spill]] }
 0x794   : > { %p19_p8 = scmp.ge.s32.totalorder %s22_s25, 6  }
 0x796   :  { %21 = sbr.rel (!%p19_p8) target bundleno = 4 (0x4), region = 135 }

</bundles_post_ra>
